<compile_context>
chip_gen: v7x
topology: tpu7x:2x2x1
jax: 0.10.0
libtpu: 0.0.40
codegen_flags: <defaults>
</compile_context>

<pallas_src>
import numpy as np
import jax
import jax.numpy as jnp
from jax.experimental import pallas as pl
from jax.experimental.pallas import tpu as pltpu


# -------------------- host-side static helpers (glue) --------------------

def _adaptive_pool_1d(out_size, in_size):
    """Row-stochastic matrix implementing nn.AdaptiveAvgPool along one axis."""
    m = np.zeros((out_size, in_size), np.float32)
    for i in range(out_size):
        start = (i * in_size) // out_size
        end = -((-(i + 1) * in_size) // out_size)  # ceil((i+1)*in/out)
        m[i, start:end] = 1.0 / (end - start)
    return m


def _bilinear_1d(out_size, in_size):
    """F.interpolate(mode='bilinear', align_corners=False) weights along one axis."""
    m = np.zeros((out_size, in_size), np.float32)
    scale = in_size / out_size
    for o in range(out_size):
        src = max((o + 0.5) * scale - 0.5, 0.0)
        i0 = int(np.floor(src))
        frac = src - i0
        i0 = min(i0, in_size - 1)
        i1 = min(i0 + 1, in_size - 1)
        m[o, i0] += 1.0 - frac
        m[o, i1] += frac
    return m


def pool_matrix(size, H, W):
    # (size*size, H*W): pooled_flat = P @ x_flat
    return jnp.asarray(np.kron(_adaptive_pool_1d(size, H), _adaptive_pool_1d(size, W)))


def upsample_matrix(H, W, size):
    # (H*W, size*size): upsampled_flat = U @ y_flat
    return jnp.asarray(np.kron(_bilinear_1d(H, size), _bilinear_1d(W, size)))


def _round_up(x, m):
    return ((x + m - 1) // m) * m


def _column_masks(tile_h, W):
    """(3, tile_h*W, 1) f32: per-dx validity of the horizontal 3x3 taps."""
    col = np.arange(W)
    left = (col != 0).astype(np.float32)        # neighbor column j-1 exists
    right = (col != W - 1).astype(np.float32)   # neighbor column j+1 exists
    ones = np.ones(W, np.float32)
    m = np.stack([np.tile(left, tile_h), np.tile(ones, tile_h),
                  np.tile(right, tile_h)], axis=0)[:, :, None]
    return jnp.asarray(m)


# -------------------- fused pyramid-stage kernel --------------------

def make_stages_kernel(n_stages, C, cpad):
    """All stages + identity branch fused: x is read once, cat is written once."""
    def kernel(x_ref, *args):
        o_ref = args[-1]
        x = x_ref[0]                                          # (HW, C) bf16
        for i in range(n_stages):
            P = args[4 * i][...]                              # (s^2, HW)  bf16
            U = args[4 * i + 1][...]                          # (HW, s^2)  bf16
            Wc = args[4 * i + 2][...]                          # (C, cpad)  bf16
            bc = args[4 * i + 3][...]                          # (1, cpad)  f32
            pooled = jnp.dot(P, x, preferred_element_type=jnp.float32)       # (s^2, C)
            y = jnp.dot(pooled.astype(jnp.bfloat16), Wc,
                        preferred_element_type=jnp.float32) + bc             # (s^2, cpad)
            y = jnp.maximum(y, 0.0)
            z = jnp.dot(U, y.astype(jnp.bfloat16),
                        preferred_element_type=jnp.float32)                  # (HW, cpad)
            # lane-aligned channel slice of the concatenated activation
            o_ref[0, :, i * cpad:(i + 1) * cpad] = z.astype(o_ref.dtype)
        # identity branch (torch.cat([...priors..., feats], 1))
        o_ref[0, :, n_stages * cpad:n_stages * cpad + C] = x.astype(o_ref.dtype)
    return kernel


def run_fused_stages(x_flat, stages, cpad):
    B, HW, C = x_flat.shape
    n_stages = len(stages)
    Ctot = n_stages * cpad + C
    inputs = [x_flat]
    in_specs = [pl.BlockSpec((1, HW, C), lambda b: (b, 0, 0))]
    for sp in stages:
        s2 = sp["P"].shape[0]
        inputs += [sp["P"], sp["U"], sp["W_eff"], sp["b_eff"]]
        in_specs += [
            pl.BlockSpec((s2, HW), lambda b: (0, 0)),
            pl.BlockSpec((HW, s2), lambda b: (0, 0)),
            pl.BlockSpec((C, cpad), lambda b: (0, 0)),
            pl.BlockSpec((1, cpad), lambda b: (0, 0)),
        ]
    return pl.pallas_call(
        make_stages_kernel(n_stages, C, cpad),
        out_shape=jax.ShapeDtypeStruct((B, HW, Ctot), jnp.float32),
        grid=(B,),
        in_specs=in_specs,
        out_specs=pl.BlockSpec((1, HW, Ctot), lambda b: (b, 0, 0)),
        compiler_params=pltpu.CompilerParams(
            dimension_semantics=("parallel",),
            vmem_limit_bytes=32 * 1024 * 1024),
    )(*inputs)


# -------------------- tiled bottleneck kernel (3x3 conv -> ReLU -> 1x1 conv) ------

def make_bottleneck_kernel(tile_h, H, W, pad_rows, Ctot, Cout):
    nrows = (tile_h + 2) * W + 2 * pad_rows      # flat VMEM slab: strip + 1 halo row/side

    def kernel(cat_hbm, w3_ref, b3_ref, wf_ref, bf_ref, mask_ref, o_ref,
               xbuf, acc, sems):
        b = pl.program_id(0)
        r = pl.program_id(1)
        nr = pl.num_programs(1)
        row0 = r * tile_h                                      # first spatial row of strip

        # ---- manual DMA of the row slab (no host-side padded tensor in HBM) ----
        top_row = jnp.maximum(row0 - 1, 0)                     # clamped; zeroed at r == 0
        bot_row = jnp.minimum(row0 + tile_h, H - 1)            # clamped; zeroed at r == last
        top_cp = pltpu.make_async_copy(
            cat_hbm.at[b, pl.ds(top_row * W, W), :],
            xbuf.at[pl.ds(pad_rows, W), :], sems.at[0])
        main_cp = pltpu.make_async_copy(
            cat_hbm.at[b, pl.ds(row0 * W, tile_h * W), :],
            xbuf.at[pl.ds(pad_rows + W, tile_h * W), :], sems.at[1])
        bot_cp = pltpu.make_async_copy(
            cat_hbm.at[b, pl.ds(bot_row * W, W), :],
            xbuf.at[pl.ds(pad_rows + (tile_h + 1) * W, W), :], sems.at[2])
        top_cp.start()
        main_cp.start()
        bot_cp.start()

        # guard rows (only ever read at masked tap positions; keep them finite)
        xbuf[0:pad_rows, :] = jnp.zeros((pad_rows, Ctot), xbuf.dtype)
        xbuf[nrows - pad_rows:nrows, :] = jnp.zeros((pad_rows, Ctot), xbuf.dtype)

        top_cp.wait()
        main_cp.wait()
        bot_cp.wait()

        # zero the halo rows at the image border (replaces the removed jnp.pad)
        @pl.when(r == 0)
        def _():
            xbuf[pad_rows:pad_rows + W, :] = jnp.zeros((W, Ctot), xbuf.dtype)

        @pl.when(r == nr - 1)
        def _():
            xbuf[pad_rows + (tile_h + 1) * W:pad_rows + (tile_h + 2) * W, :] = (
                jnp.zeros((W, Ctot), xbuf.dtype))

        # ---- 3x3 conv (BN folded) as 9 shifted strip matmuls into a VMEM f32 acc ----
        acc[...] = jnp.zeros_like(acc)
        for dy in range(3):
            for dx in range(3):
                t = dy * 3 + dx
                start = pad_rows + dy * W + dx - 1           # flat offset of this tap
                patch = xbuf[start:start + tile_h * W, :]    # (tile_h*W, Ctot) f32
                tap = jnp.dot(patch.astype(jnp.bfloat16), w3_ref[t],
                              preferred_element_type=jnp.float32)
                if dx != 1:                                  # invalid left/right neighbors
                    tap = tap * mask_ref[dx]
                acc[...] += tap

        h1 = jnp.maximum(acc[...] + b3_ref[...], 0.0)        # (tile_h*W, Cout) f32
        out = jnp.dot(h1.astype(wf_ref.dtype), wf_ref[...],
                      preferred_element_type=jnp.float32) + bf_ref[...]
        o_ref[0] = out.astype(o_ref.dtype)

    return kernel


def run_bottleneck(cat, w3_pad, b3, wf, bfb, H, W, tile_h):
    B, HW, Ctot = cat.shape
    Cout = wf.shape[-1]
    assert H % tile_h == 0, (H, tile_h)
    n_strips = H // tile_h
    pad_rows = 8
    nrows = (tile_h + 2) * W + 2 * pad_rows
    masks = _column_masks(tile_h, W)                          # (3, tile_h*W, 1) f32
    kernel = make_bottleneck_kernel(tile_h, H, W, pad_rows, Ctot, Cout)
    return pl.pallas_call(
        kernel,
        out_shape=jax.ShapeDtypeStruct((B, HW, Cout), jnp.float32),
        grid=(B, n_strips),
        in_specs=[
            pl.BlockSpec(memory_space=pl.ANY),                         # cat: manual DMA
            pl.BlockSpec((9, Ctot, Cout), lambda b, r: (0, 0, 0)),     # 3x3 weights (bf16)
            pl.BlockSpec((1, Cout), lambda b, r: (0, 0)),              # folded BN bias
            pl.BlockSpec((Cout, Cout), lambda b, r: (0, 0)),           # final 1x1 weights
            pl.BlockSpec((1, Cout), lambda b, r: (0, 0)),              # final 1x1 bias
            pl.BlockSpec((3, tile_h * W, 1), lambda b, r: (0, 0, 0)),  # column masks
        ],
        out_specs=pl.BlockSpec((1, tile_h * W, Cout), lambda b, r: (b, r, 0)),
        scratch_shapes=[
            pltpu.VMEM((nrows, Ctot), cat.dtype),                      # row slab
            pltpu.VMEM((tile_h * W, Cout), jnp.float32),               # conv accumulator
            pltpu.SemaphoreType.DMA((3,)),
        ],
        compiler_params=pltpu.CompilerParams(
            dimension_semantics=("parallel", "parallel"),
            vmem_limit_bytes=32 * 1024 * 1024),
    )(cat, w3_pad, b3, wf, bfb, masks)


# -------------------- full PSPModule forward --------------------

def psp_forward(x_nchw, params, *, tile_h=8):
    B, C, H, W = x_nchw.shape
    cpad = params["cout_pad"]
    x_flat = jnp.transpose(x_nchw, (0, 2, 3, 1)).reshape(B, H * W, C).astype(jnp.bfloat16)
    cat = run_fused_stages(x_flat, params["stages"], cpad)     # (B, HW, Ctot_pad)
    out_flat = run_bottleneck(cat, params["W3_pad"], params["b3_eff"],
                              params["Wf"], params["bf"], H, W, tile_h)
    Cout = out_flat.shape[-1]
    return jnp.transpose(out_flat.reshape(B, H, W, Cout), (0, 3, 1, 2))  # back to NCHW


# -------------------- pure-JAX reference (mirrors kernel numerics) --------------------

def psp_reference(x_nchw, params):
    B, C, H, W = x_nchw.shape
    Cout = params["Cout"]
    x_flat = jnp.transpose(x_nchw, (0, 2, 3, 1)).reshape(B, H * W, C).astype(jnp.bfloat16)
    outs = []
    for b in range(B):
        x = x_flat[b]
        parts = []
        for sp in params["stages"]:
            Wc = sp["W_eff"][:, :Cout]
            bc = sp["b_eff"][:, :Cout]
            pooled = jnp.dot(sp["P"], x, preferred_element_type=jnp.float32)
            y = jnp.maximum(jnp.dot(pooled.astype(jnp.bfloat16), Wc,
                                    preferred_element_type=jnp.float32) + bc, 0.0)
            z = jnp.dot(sp["U"], y.astype(jnp.bfloat16),
                        preferred_element_type=jnp.float32)
            parts.append(z.astype(jnp.bfloat16))
        parts.append(x)
        cat = jnp.concatenate(parts, axis=-1).reshape(H, W, -1)
        catp = jnp.pad(cat, ((1, 1), (1, 1), (0, 0)))
        acc = jnp.zeros((H * W, Cout), jnp.float32)
        for t in range(9):
            dy, dx = t // 3, t % 3
            patch = catp[dy:dy + H, dx:dx + W, :].reshape(H * W, -1)
            acc = acc + jnp.dot(patch, params["W3_true"][t],
                                preferred_element_type=jnp.float32)
        h1 = jnp.maximum(acc + params["b3_eff"], 0.0)
        out = jnp.dot(h1.astype(jnp.bfloat16), params["Wf"],
                      preferred_element_type=jnp.float32) + params["bf"]
        outs.append(out)
    out = jnp.stack(outs, axis=0)
    return jnp.transpose(out.reshape(B, H, W, Cout), (0, 3, 1, 2))


# -------------------- deterministic parameter construction --------------------

def make_params(key, C, Cout, H, W, sizes=(1, 2, 3, 6), eps=1e-5):
    keys = jax.random.split(key, len(sizes) + 2)
    cpad = _round_up(Cout, 128)   # lane-align each stage's channel slice in `cat`

    def bn_fold(k, channels):
        kg, kb, km, kv = jax.random.split(k, 4)
        gamma = 1.0 + 0.1 * jax.random.normal(kg, (channels,), jnp.float32)
        beta = 0.1 * jax.random.normal(kb, (channels,), jnp.float32)
        mean = 0.1 * jax.random.normal(km, (channels,), jnp.float32)
        var = 1.0 + 0.5 * jnp.abs(jax.random.normal(kv, (channels,), jnp.float32))
        scale = gamma / jnp.sqrt(var + eps)
        shift = beta - mean * scale
        return scale, shift

    stages = []
    for i, s in enumerate(sizes):
        kw, kbn = jax.random.split(keys[i], 2)
        w1 = 0.1 * jax.random.normal(kw, (C, Cout), jnp.float32)       # 1x1 conv, no bias
        scale, shift = bn_fold(kbn, Cout)
        w_eff = jnp.zeros((C, cpad), jnp.float32).at[:, :Cout].set(w1 * scale[None, :])
        b_eff = jnp.zeros((1, cpad), jnp.float32).at[:, :Cout].set(shift[None, :])
        stages.append(dict(
            P=pool_matrix(s, H, W).astype(jnp.bfloat16),
            U=upsample_matrix(H, W, s).astype(jnp.bfloat16),
            W_eff=w_eff.astype(jnp.bfloat16),
            b_eff=b_eff,                                               # f32 (bias stays f32)
        ))

    n_stages = len(sizes)
    Ctot_true = C + n_stages * Cout
    Ctot_pad = n_stages * cpad + C
    k3, kbn3 = jax.random.split(keys[n_stages], 2)
    w3 = 0.05 * jax.random.normal(k3, (3, 3, Ctot_true, Cout), jnp.float32)  # 3x3, no bias
    scale3, shift3 = bn_fold(kbn3, Cout)
    w3_eff = (w3 * scale3[None, None, None, :]).reshape(9, Ctot_true, Cout)
    # scatter true input channels into the lane-padded `cat` layout (pad rows stay 0)
    w3_pad = jnp.zeros((9, Ctot_pad, Cout), jnp.float32)
    for i in range(n_stages):
        w3_pad = w3_pad.at[:, i * cpad:i * cpad + Cout, :].set(
            w3_eff[:, i * Cout:(i + 1) * Cout, :])
    w3_pad = w3_pad.at[:, n_stages * cpad:, :].set(w3_eff[:, n_stages * Cout:, :])

    kwf, kbf = jax.random.split(keys[n_stages + 1], 2)
    return dict(
        stages=stages,
        W3_pad=w3_pad.astype(jnp.bfloat16),
        W3_true=w3_eff.astype(jnp.bfloat16),                            # reference only
        b3_eff=shift3[None, :],
        Wf=(0.1 * jax.random.normal(kwf, (Cout, Cout), jnp.float32)).astype(jnp.bfloat16),
        bf=0.1 * jax.random.normal(kbf, (1, Cout), jnp.float32),
        cout_pad=cpad,
        Cout=Cout,
    )


if __name__ == "__main__":
    B, C, H, W = 2, 4, 16, 16       # features = 4
    Cout = 32                       # out_features = 32 (small synthetic config)
    sizes = (1, 2, 3, 6)

    key = jax.random.PRNGKey(0)
    kx, kp = jax.random.split(key)
    x = jax.random.normal(kx, (B, C, H, W), jnp.float32)
    params = make_params(kp, C, Cout, H, W, sizes)

    out = psp_forward(x, params, tile_h=8)
    out = jax.block_until_ready(out)

    ref = psp_reference(x, params)
    assert out.shape == (B, Cout, H, W), out.shape
    assert bool(jnp.all(jnp.isfinite(out)))
    max_err = float(jnp.max(jnp.abs(out - ref)))
    assert bool(jnp.allclose(out, ref, rtol=5e-2, atol=5e-3)), (
        f"mismatch vs pure-JAX reference, max|diff|={max_err}")
    print("KERNEL_OK")
</pallas_src>

<mosaic_0001>
module attributes {stable_mosaic.version = 11 : i64} {
  func.func @kernel(%arg0: i32, %arg1: memref<1x256x4xbf16, #tpu.memory_space<vmem>>, %arg2: memref<1x256xbf16, #tpu.memory_space<vmem>>, %arg3: memref<256x1xbf16, #tpu.memory_space<vmem>>, %arg4: memref<4x128xbf16, #tpu.memory_space<vmem>>, %arg5: memref<1x128xf32, #tpu.memory_space<vmem>>, %arg6: memref<4x256xbf16, #tpu.memory_space<vmem>>, %arg7: memref<256x4xbf16, #tpu.memory_space<vmem>>, %arg8: memref<4x128xbf16, #tpu.memory_space<vmem>>, %arg9: memref<1x128xf32, #tpu.memory_space<vmem>>, %arg10: memref<9x256xbf16, #tpu.memory_space<vmem>>, %arg11: memref<256x9xbf16, #tpu.memory_space<vmem>>, %arg12: memref<4x128xbf16, #tpu.memory_space<vmem>>, %arg13: memref<1x128xf32, #tpu.memory_space<vmem>>, %arg14: memref<36x256xbf16, #tpu.memory_space<vmem>>, %arg15: memref<256x36xbf16, #tpu.memory_space<vmem>>, %arg16: memref<4x128xbf16, #tpu.memory_space<vmem>>, %arg17: memref<1x128xf32, #tpu.memory_space<vmem>>, %arg18: memref<1x256x516xf32, #tpu.memory_space<vmem>>) attributes {dimension_semantics = [#tpu.dimension_semantics<parallel>], iteration_bounds = array<i64: 2>, scalar_prefetch = 0 : i64, scratch_operands = 0 : i64, tpu.core_type = #tpu.core_type<tc>, window_params = [{transform_indices = @transform_0, window_bounds = array<i64: 1, 256, 4>}, {pipeline_mode = #tpu.pipeline_mode<synchronous>, transform_indices = @transform_1, window_bounds = array<i64: 1, 256>}, {pipeline_mode = #tpu.pipeline_mode<synchronous>, transform_indices = @transform_2, window_bounds = array<i64: 256, 1>}, {pipeline_mode = #tpu.pipeline_mode<synchronous>, transform_indices = @transform_3, window_bounds = array<i64: 4, 128>}, {pipeline_mode = #tpu.pipeline_mode<synchronous>, transform_indices = @transform_4, window_bounds = array<i64: 1, 128>}, {pipeline_mode = #tpu.pipeline_mode<synchronous>, transform_indices = @transform_5, window_bounds = array<i64: 4, 256>}, {pipeline_mode = #tpu.pipeline_mode<synchronous>, transform_indices = @transform_6, window_bounds = array<i64: 256, 4>}, {pipeline_mode = #tpu.pipeline_mode<synchronous>, transform_indices = @transform_7, window_bounds = array<i64: 4, 128>}, {pipeline_mode = #tpu.pipeline_mode<synchronous>, transform_indices = @transform_8, window_bounds = array<i64: 1, 128>}, {pipeline_mode = #tpu.pipeline_mode<synchronous>, transform_indices = @transform_9, window_bounds = array<i64: 9, 256>}, {pipeline_mode = #tpu.pipeline_mode<synchronous>, transform_indices = @transform_10, window_bounds = array<i64: 256, 9>}, {pipeline_mode = #tpu.pipeline_mode<synchronous>, transform_indices = @transform_11, window_bounds = array<i64: 4, 128>}, {pipeline_mode = #tpu.pipeline_mode<synchronous>, transform_indices = @transform_12, window_bounds = array<i64: 1, 128>}, {pipeline_mode = #tpu.pipeline_mode<synchronous>, transform_indices = @transform_13, window_bounds = array<i64: 36, 256>}, {pipeline_mode = #tpu.pipeline_mode<synchronous>, transform_indices = @transform_14, window_bounds = array<i64: 256, 36>}, {pipeline_mode = #tpu.pipeline_mode<synchronous>, transform_indices = @transform_15, window_bounds = array<i64: 4, 128>}, {pipeline_mode = #tpu.pipeline_mode<synchronous>, transform_indices = @transform_16, window_bounds = array<i64: 1, 128>}, {transform_indices = @transform_17, window_bounds = array<i64: 1, 256, 516>}]} {
    %c0 = arith.constant 0 : index
    %c0_0 = arith.constant 0 : index
    %c0_1 = arith.constant 0 : index
    %0 = vector.load %arg1[%c0, %c0_0, %c0_1] : memref<1x256x4xbf16, #tpu.memory_space<vmem>>, vector<1x256x4xbf16>
    %1 = vector.shape_cast %0 : vector<1x256x4xbf16> to vector<256x4xbf16>
    %c0_2 = arith.constant 0 : index
    %c0_3 = arith.constant 0 : index
    %2 = vector.load %arg2[%c0_2, %c0_3] : memref<1x256xbf16, #tpu.memory_space<vmem>>, vector<1x256xbf16>
    %c0_4 = arith.constant 0 : index
    %c0_5 = arith.constant 0 : index
    %3 = vector.load %arg3[%c0_4, %c0_5] : memref<256x1xbf16, #tpu.memory_space<vmem>>, vector<256x1xbf16>
    %c0_6 = arith.constant 0 : index
    %c0_7 = arith.constant 0 : index
    %4 = vector.load %arg4[%c0_6, %c0_7] : memref<4x128xbf16, #tpu.memory_space<vmem>>, vector<4x128xbf16>
    %c0_8 = arith.constant 0 : index
    %c0_9 = arith.constant 0 : index
    %5 = vector.load %arg5[%c0_8, %c0_9] : memref<1x128xf32, #tpu.memory_space<vmem>>, vector<1x128xf32>
    %cst = arith.constant dense<0.000000e+00> : vector<1x4xf32>
    %6 = tpu.matmul %2, %1, %cst {dimension_numbers = #tpu.dot_dimension_numbers<[1], [0], [0], [1], [0, 0, 1, 1], [], []>} : vector<1x256xbf16>, vector<256x4xbf16>, vector<1x4xf32> -> vector<1x4xf32>
    %7 = arith.truncf %6 : vector<1x4xf32> to vector<1x4xbf16>
    %cst_10 = arith.constant dense<0.000000e+00> : vector<1x128xf32>
    %8 = tpu.matmul %7, %4, %cst_10 {dimension_numbers = #tpu.dot_dimension_numbers<[1], [0], [0], [1], [0, 0, 1, 1], [], []>} : vector<1x4xbf16>, vector<4x128xbf16>, vector<1x128xf32> -> vector<1x128xf32>
    %9 = arith.addf %8, %5 : vector<1x128xf32>
    %cst_11 = arith.constant 0.000000e+00 : f32
    %10 = vector.broadcast %cst_11 : f32 to vector<1x128xf32>
    %11 = arith.maximumf %9, %10 : vector<1x128xf32>
    %12 = arith.truncf %11 : vector<1x128xf32> to vector<1x128xbf16>
    %cst_12 = arith.constant dense<0.000000e+00> : vector<256x128xf32>
    %13 = tpu.matmul %3, %12, %cst_12 {dimension_numbers = #tpu.dot_dimension_numbers<[1], [0], [0], [1], [0, 0, 1, 1], [], []>} : vector<256x1xbf16>, vector<1x128xbf16>, vector<256x128xf32> -> vector<256x128xf32>
    %c0_13 = arith.constant 0 : index
    %c0_14 = arith.constant 0 : index
    %c0_15 = arith.constant 0 : index
    %14 = vector.load %arg18[%c0_13, %c0_14, %c0_15] : memref<1x256x516xf32, #tpu.memory_space<vmem>>, vector<1x256x128xf32>
    %15 = vector.shape_cast %14 : vector<1x256x128xf32> to vector<256x128xf32>
    %16 = vector.shape_cast %13 : vector<256x128xf32> to vector<1x256x128xf32>
    tpu.vector_store %arg18[%c0_13, %c0_14, %c0_15], %16 {strides = array<i32>} : memref<1x256x516xf32, #tpu.memory_space<vmem>>, vector<1x256x128xf32>,
    %c0_16 = arith.constant 0 : index
    %c0_17 = arith.constant 0 : index
    %17 = vector.load %arg6[%c0_16, %c0_17] : memref<4x256xbf16, #tpu.memory_space<vmem>>, vector<4x256xbf16>
    %c0_18 = arith.constant 0 : index
    %c0_19 = arith.constant 0 : index
    %18 = vector.load %arg7[%c0_18, %c0_19] : memref<256x4xbf16, #tpu.memory_space<vmem>>, vector<256x4xbf16>
    %c0_20 = arith.constant 0 : index
    %c0_21 = arith.constant 0 : index
    %19 = vector.load %arg8[%c0_20, %c0_21] : memref<4x128xbf16, #tpu.memory_space<vmem>>, vector<4x128xbf16>
    %c0_22 = arith.constant 0 : index
    %c0_23 = arith.constant 0 : index
    %20 = vector.load %arg9[%c0_22, %c0_23] : memref<1x128xf32, #tpu.memory_space<vmem>>, vector<1x128xf32>
    %cst_24 = arith.constant dense<0.000000e+00> : vector<4x4xf32>
    %21 = tpu.matmul %17, %1, %cst_24 {dimension_numbers = #tpu.dot_dimension_numbers<[1], [0], [0], [1], [0, 0, 1, 1], [], []>} : vector<4x256xbf16>, vector<256x4xbf16>, vector<4x4xf32> -> vector<4x4xf32>
    %22 = arith.truncf %21 : vector<4x4xf32> to vector<4x4xbf16>
    %cst_25 = arith.constant dense<0.000000e+00> : vector<4x128xf32>
    %23 = tpu.matmul %22, %19, %cst_25 {dimension_numbers = #tpu.dot_dimension_numbers<[1], [0], [0], [1], [0, 0, 1, 1], [], []>} : vector<4x4xbf16>, vector<4x128xbf16>, vector<4x128xf32> -> vector<4x128xf32>
    %24 = vector.broadcast %20 : vector<1x128xf32> to vector<4x128xf32>
    %25 = arith.addf %23, %24 : vector<4x128xf32>
    %cst_26 = arith.constant 0.000000e+00 : f32
    %26 = vector.broadcast %cst_26 : f32 to vector<4x128xf32>
    %27 = arith.maximumf %25, %26 : vector<4x128xf32>
    %28 = arith.truncf %27 : vector<4x128xf32> to vector<4x128xbf16>
    %cst_27 = arith.constant dense<0.000000e+00> : vector<256x128xf32>
    %29 = tpu.matmul %18, %28, %cst_27 {dimension_numbers = #tpu.dot_dimension_numbers<[1], [0], [0], [1], [0, 0, 1, 1], [], []>} : vector<256x4xbf16>, vector<4x128xbf16>, vector<256x128xf32> -> vector<256x128xf32>
    %c0_28 = arith.constant 0 : index
    %c0_29 = arith.constant 0 : index
    %c128 = arith.constant 128 : index
    %30 = vector.load %arg18[%c0_28, %c0_29, %c128] : memref<1x256x516xf32, #tpu.memory_space<vmem>>, vector<1x256x128xf32>
    %31 = vector.shape_cast %30 : vector<1x256x128xf32> to vector<256x128xf32>
    %32 = vector.shape_cast %29 : vector<256x128xf32> to vector<1x256x128xf32>
    tpu.vector_store %arg18[%c0_28, %c0_29, %c128], %32 {strides = array<i32>} : memref<1x256x516xf32, #tpu.memory_space<vmem>>, vector<1x256x128xf32>,
    %c0_30 = arith.constant 0 : index
    %c0_31 = arith.constant 0 : index
    %33 = vector.load %arg10[%c0_30, %c0_31] : memref<9x256xbf16, #tpu.memory_space<vmem>>, vector<9x256xbf16>
    %c0_32 = arith.constant 0 : index
    %c0_33 = arith.constant 0 : index
    %34 = vector.load %arg11[%c0_32, %c0_33] : memref<256x9xbf16, #tpu.memory_space<vmem>>, vector<256x9xbf16>
    %c0_34 = arith.constant 0 : index
    %c0_35 = arith.constant 0 : index
    %35 = vector.load %arg12[%c0_34, %c0_35] : memref<4x128xbf16, #tpu.memory_space<vmem>>, vector<4x128xbf16>
    %c0_36 = arith.constant 0 : index
    %c0_37 = arith.constant 0 : index
    %36 = vector.load %arg13[%c0_36, %c0_37] : memref<1x128xf32, #tpu.memory_space<vmem>>, vector<1x128xf32>
    %cst_38 = arith.constant dense<0.000000e+00> : vector<9x4xf32>
    %37 = tpu.matmul %33, %1, %cst_38 {dimension_numbers = #tpu.dot_dimension_numbers<[1], [0], [0], [1], [0, 0, 1, 1], [], []>} : vector<9x256xbf16>, vector<256x4xbf16>, vector<9x4xf32> -> vector<9x4xf32>
    %38 = arith.truncf %37 : vector<9x4xf32> to vector<9x4xbf16>
    %cst_39 = arith.constant dense<0.000000e+00> : vector<9x128xf32>
    %39 = tpu.matmul %38, %35, %cst_39 {dimension_numbers = #tpu.dot_dimension_numbers<[1], [0], [0], [1], [0, 0, 1, 1], [], []>} : vector<9x4xbf16>, vector<4x128xbf16>, vector<9x128xf32> -> vector<9x128xf32>
    %40 = vector.broadcast %36 : vector<1x128xf32> to vector<9x128xf32>
    %41 = arith.addf %39, %40 : vector<9x128xf32>
    %cst_40 = arith.constant 0.000000e+00 : f32
    %42 = vector.broadcast %cst_40 : f32 to vector<9x128xf32>
    %43 = arith.maximumf %41, %42 : vector<9x128xf32>
    %44 = arith.truncf %43 : vector<9x128xf32> to vector<9x128xbf16>
    %cst_41 = arith.constant dense<0.000000e+00> : vector<256x128xf32>
    %45 = tpu.matmul %34, %44, %cst_41 {dimension_numbers = #tpu.dot_dimension_numbers<[1], [0], [0], [1], [0, 0, 1, 1], [], []>} : vector<256x9xbf16>, vector<9x128xbf16>, vector<256x128xf32> -> vector<256x128xf32>
    %c0_42 = arith.constant 0 : index
    %c0_43 = arith.constant 0 : index
    %c256 = arith.constant 256 : index
    %46 = vector.load %arg18[%c0_42, %c0_43, %c256] : memref<1x256x516xf32, #tpu.memory_space<vmem>>, vector<1x256x128xf32>
    %47 = vector.shape_cast %46 : vector<1x256x128xf32> to vector<256x128xf32>
    %48 = vector.shape_cast %45 : vector<256x128xf32> to vector<1x256x128xf32>
    tpu.vector_store %arg18[%c0_42, %c0_43, %c256], %48 {strides = array<i32>} : memref<1x256x516xf32, #tpu.memory_space<vmem>>, vector<1x256x128xf32>,
    %c0_44 = arith.constant 0 : index
    %c0_45 = arith.constant 0 : index
    %49 = vector.load %arg14[%c0_44, %c0_45] : memref<36x256xbf16, #tpu.memory_space<vmem>>, vector<36x256xbf16>
    %c0_46 = arith.constant 0 : index
    %c0_47 = arith.constant 0 : index
    %50 = vector.load %arg15[%c0_46, %c0_47] : memref<256x36xbf16, #tpu.memory_space<vmem>>, vector<256x36xbf16>
    %c0_48 = arith.constant 0 : index
    %c0_49 = arith.constant 0 : index
    %51 = vector.load %arg16[%c0_48, %c0_49] : memref<4x128xbf16, #tpu.memory_space<vmem>>, vector<4x128xbf16>
    %c0_50 = arith.constant 0 : index
    %c0_51 = arith.constant 0 : index
    %52 = vector.load %arg17[%c0_50, %c0_51] : memref<1x128xf32, #tpu.memory_space<vmem>>, vector<1x128xf32>
    %cst_52 = arith.constant dense<0.000000e+00> : vector<36x4xf32>
    %53 = tpu.matmul %49, %1, %cst_52 {dimension_numbers = #tpu.dot_dimension_numbers<[1], [0], [0], [1], [0, 0, 1, 1], [], []>} : vector<36x256xbf16>, vector<256x4xbf16>, vector<36x4xf32> -> vector<36x4xf32>
    %54 = arith.truncf %53 : vector<36x4xf32> to vector<36x4xbf16>
    %cst_53 = arith.constant dense<0.000000e+00> : vector<36x128xf32>
    %55 = tpu.matmul %54, %51, %cst_53 {dimension_numbers = #tpu.dot_dimension_numbers<[1], [0], [0], [1], [0, 0, 1, 1], [], []>} : vector<36x4xbf16>, vector<4x128xbf16>, vector<36x128xf32> -> vector<36x128xf32>
    %56 = vector.broadcast %52 : vector<1x128xf32> to vector<36x128xf32>
    %57 = arith.addf %55, %56 : vector<36x128xf32>
    %cst_54 = arith.constant 0.000000e+00 : f32
    %58 = vector.broadcast %cst_54 : f32 to vector<36x128xf32>
    %59 = arith.maximumf %57, %58 : vector<36x128xf32>
    %60 = arith.truncf %59 : vector<36x128xf32> to vector<36x128xbf16>
    %cst_55 = arith.constant dense<0.000000e+00> : vector<256x128xf32>
    %61 = tpu.matmul %50, %60, %cst_55 {dimension_numbers = #tpu.dot_dimension_numbers<[1], [0], [0], [1], [0, 0, 1, 1], [], []>} : vector<256x36xbf16>, vector<36x128xbf16>, vector<256x128xf32> -> vector<256x128xf32>
    %c0_56 = arith.constant 0 : index
    %c0_57 = arith.constant 0 : index
    %c384 = arith.constant 384 : index
    %62 = vector.load %arg18[%c0_56, %c0_57, %c384] : memref<1x256x516xf32, #tpu.memory_space<vmem>>, vector<1x256x128xf32>
    %63 = vector.shape_cast %62 : vector<1x256x128xf32> to vector<256x128xf32>
    %64 = vector.shape_cast %61 : vector<256x128xf32> to vector<1x256x128xf32>
    tpu.vector_store %arg18[%c0_56, %c0_57, %c384], %64 {strides = array<i32>} : memref<1x256x516xf32, #tpu.memory_space<vmem>>, vector<1x256x128xf32>,
    %65 = arith.extf %1 : vector<256x4xbf16> to vector<256x4xf32>
    %c0_58 = arith.constant 0 : index
    %c0_59 = arith.constant 0 : index
    %c512 = arith.constant 512 : index
    %66 = vector.load %arg18[%c0_58, %c0_59, %c512] : memref<1x256x516xf32, #tpu.memory_space<vmem>>, vector<1x256x4xf32>
    %67 = vector.shape_cast %66 : vector<1x256x4xf32> to vector<256x4xf32>
    %68 = vector.shape_cast %65 : vector<256x4xf32> to vector<1x256x4xf32>
    tpu.vector_store %arg18[%c0_58, %c0_59, %c512], %68 {strides = array<i32>} : memref<1x256x516xf32, #tpu.memory_space<vmem>>, vector<1x256x4xf32>,
    return
  }
  func.func @transform_0(%arg0: i32) -> (i32, i32, i32) {
    %c0_i32 = arith.constant 0 : i32
    %c0_i32_0 = arith.constant 0 : i32
    %c0_i32_1 = arith.constant 0 : i32
    return %arg0, %c0_i32, %c0_i32_0 : i32, i32, i32
  }
  func.func @transform_1(%arg0: i32) -> (i32, i32) {
    %c0_i32 = arith.constant 0 : i32
    %c0_i32_0 = arith.constant 0 : i32
    %c0_i32_1 = arith.constant 0 : i32
    return %c0_i32, %c0_i32_0 : i32, i32
  }
  func.func @transform_2(%arg0: i32) -> (i32, i32) {
    %c0_i32 = arith.constant 0 : i32
    %c0_i32_0 = arith.constant 0 : i32
    %c0_i32_1 = arith.constant 0 : i32
    return %c0_i32, %c0_i32_0 : i32, i32
  }
  func.func @transform_3(%arg0: i32) -> (i32, i32) {
    %c0_i32 = arith.constant 0 : i32
    %c0_i32_0 = arith.constant 0 : i32
    %c0_i32_1 = arith.constant 0 : i32
    return %c0_i32, %c0_i32_0 : i32, i32
  }
  func.func @transform_4(%arg0: i32) -> (i32, i32) {
    %c0_i32 = arith.constant 0 : i32
    %c0_i32_0 = arith.constant 0 : i32
    %c0_i32_1 = arith.constant 0 : i32
    return %c0_i32, %c0_i32_0 : i32, i32
  }
  func.func @transform_5(%arg0: i32) -> (i32, i32) {
    %c0_i32 = arith.constant 0 : i32
    %c0_i32_0 = arith.constant 0 : i32
    %c0_i32_1 = arith.constant 0 : i32
    return %c0_i32, %c0_i32_0 : i32, i32
  }
  func.func @transform_6(%arg0: i32) -> (i32, i32) {
    %c0_i32 = arith.constant 0 : i32
    %c0_i32_0 = arith.constant 0 : i32
    %c0_i32_1 = arith.constant 0 : i32
    return %c0_i32, %c0_i32_0 : i32, i32
  }
  func.func @transform_7(%arg0: i32) -> (i32, i32) {
    %c0_i32 = arith.constant 0 : i32
    %c0_i32_0 = arith.constant 0 : i32
    %c0_i32_1 = arith.constant 0 : i32
    return %c0_i32, %c0_i32_0 : i32, i32
  }
  func.func @transform_8(%arg0: i32) -> (i32, i32) {
    %c0_i32 = arith.constant 0 : i32
    %c0_i32_0 = arith.constant 0 : i32
    %c0_i32_1 = arith.constant 0 : i32
    return %c0_i32, %c0_i32_0 : i32, i32
  }
  func.func @transform_9(%arg0: i32) -> (i32, i32) {
    %c0_i32 = arith.constant 0 : i32
    %c0_i32_0 = arith.constant 0 : i32
    %c0_i32_1 = arith.constant 0 : i32
    return %c0_i32, %c0_i32_0 : i32, i32
  }
  func.func @transform_10(%arg0: i32) -> (i32, i32) {
    %c0_i32 = arith.constant 0 : i32
    %c0_i32_0 = arith.constant 0 : i32
    %c0_i32_1 = arith.constant 0 : i32
    return %c0_i32, %c0_i32_0 : i32, i32
  }
  func.func @transform_11(%arg0: i32) -> (i32, i32) {
    %c0_i32 = arith.constant 0 : i32
    %c0_i32_0 = arith.constant 0 : i32
    %c0_i32_1 = arith.constant 0 : i32
    return %c0_i32, %c0_i32_0 : i32, i32
  }
  func.func @transform_12(%arg0: i32) -> (i32, i32) {
    %c0_i32 = arith.constant 0 : i32
    %c0_i32_0 = arith.constant 0 : i32
    %c0_i32_1 = arith.constant 0 : i32
    return %c0_i32, %c0_i32_0 : i32, i32
  }
  func.func @transform_13(%arg0: i32) -> (i32, i32) {
    %c0_i32 = arith.constant 0 : i32
    %c0_i32_0 = arith.constant 0 : i32
    %c0_i32_1 = arith.constant 0 : i32
    return %c0_i32, %c0_i32_0 : i32, i32
  }
  func.func @transform_14(%arg0: i32) -> (i32, i32) {
    %c0_i32 = arith.constant 0 : i32
    %c0_i32_0 = arith.constant 0 : i32
    %c0_i32_1 = arith.constant 0 : i32
    return %c0_i32, %c0_i32_0 : i32, i32
  }
  func.func @transform_15(%arg0: i32) -> (i32, i32) {
    %c0_i32 = arith.constant 0 : i32
    %c0_i32_0 = arith.constant 0 : i32
    %c0_i32_1 = arith.constant 0 : i32
    return %c0_i32, %c0_i32_0 : i32, i32
  }
  func.func @transform_16(%arg0: i32) -> (i32, i32) {
    %c0_i32 = arith.constant 0 : i32
    %c0_i32_0 = arith.constant 0 : i32
    %c0_i32_1 = arith.constant 0 : i32
    return %c0_i32, %c0_i32_0 : i32, i32
  }
  func.func @transform_17(%arg0: i32) -> (i32, i32, i32) {
    %c0_i32 = arith.constant 0 : i32
    %c0_i32_0 = arith.constant 0 : i32
    %c0_i32_1 = arith.constant 0 : i32
    return %arg0, %c0_i32, %c0_i32_0 : i32, i32, i32
  }
}

</mosaic_0001>

<bundles_post_ra>
// kernel: tpu_custom_call.1
= control target key start
LH: loop header
LB: loop body
LE: loop exit
PB: predicated region body
PF: predicated region fallthrough
CT: control target
= control target key end

     0   :  { %s5242_s0 = inlined_call_operand.vmem [shape: bf16[2,256,4], index: 0, kind: input, shape index: {}]   ;;  %s5243_s1 = inlined_call_operand.hbm [shape: bf16[1,256], index: 1, kind: input, shape index: {}]   ;;  %s5244_s2 = inlined_call_operand.vmem [shape: bf16[256,1], index: 2, kind: input, shape index: {}]   ;;  %s5245_s3 = inlined_call_operand.hbm [shape: bf16[4,128], index: 3, kind: input, shape index: {}]   ;;  %s5246_s4 = inlined_call_operand.hbm [shape: f32[1,128], index: 4, kind: input, shape index: {}]   ;;  %s5247_s5 = inlined_call_operand.hbm [shape: bf16[4,256], index: 5, kind: input, shape index: {}]   ;;  %s5248_s6 = inlined_call_operand.vmem [shape: bf16[256,4], index: 6, kind: input, shape index: {}]   ;;  %s5249_s7 = inlined_call_operand.hbm [shape: bf16[4,128], index: 7, kind: input, shape index: {}]   ;;  %s5250_s8 = inlined_call_operand.hbm [shape: f32[1,128], index: 8, kind: input, shape index: {}]   ;;  %s5251_s9 = inlined_call_operand.hbm [shape: bf16[9,256], index: 9, kind: input, shape index: {}]   ;;  %s5252_s10 = inlined_call_operand.vmem [shape: bf16[256,9], index: 10, kind: input, shape index: {}]   ;;  %s5253_s11 = inlined_call_operand.hbm [shape: bf16[4,128], index: 11, kind: input, shape index: {}]   ;;  %s5254_s12 = inlined_call_operand.hbm [shape: f32[1,128], index: 12, kind: input, shape index: {}]   ;;  %s5255_s13 = inlined_call_operand.hbm [shape: bf16[36,256], index: 13, kind: input, shape index: {}]   ;;  %s5256_s14 = inlined_call_operand.vmem [shape: bf16[256,36], index: 14, kind: input, shape index: {}]   ;;  %s5257_s15 = inlined_call_operand.hbm [shape: bf16[4,128], index: 15, kind: input, shape index: {}]   ;;  %s5258_s16 = inlined_call_operand.hbm [shape: f32[1,128], index: 16, kind: input, shape index: {}]   ;;  %s5259_s17 = inlined_call_operand.vmem [shape: f32[2,256,516], index: 17, kind: output, shape index: {}]  }
   0x1   :  { %5268 = sst [smem:[#allocation29_spill]] %s5242_s0 }
   0x2   :  { %5269 = sst [smem:[#allocation30_spill]] %s5243_s1 }
   0x3   :  { %5270 = sst [smem:[#allocation31_spill]] %s5245_s3 }
   0x4   :  { %5271 = sst [smem:[#allocation32_spill]] %s5252_s10 }
   0x5   :  { %5272 = sst [smem:[#allocation33_spill]] %s5256_s14 }
   0x6   :  { %22 = vsyncpa [#allocation3], 0 }
   0x7   :  { %23 = vsyncpa [#allocation5], 0 }
   0x8   :  { %24 = vsyncpa [#allocation8], 0 }
   0x9   :  { %25 = vsyncpa [#allocation11], 0 }
   0xa   :  { %26 = vsyncpa [#allocation14], 0 }
   0xb   :  { %27 = vsyncpa [#allocation17], 0 }
   0xc   :  { %28 = vsyncpa [#allocation20], 0  ;;  %s4295_s24 = smov 0  }
   0xd LB: > { %5273 = sst [smem:[#allocation28_spill]] %s4184_s24  ;;  %s4186_s25 = smov [#allocation4]   ;;  %s4184_s24 = sphi %s4295_s24, %s34_s24  }
   0xe   : > { %s454_s26 = sshll.u32 %s4186_s25, 4  ;;  %s4301_s27 = sadd.s32 4294967295, %s4184_s24   ;;  %s4306_s26 = int_to_ptr.vmem [resolvable:$true] %s454_s26 }
   0xf   : > { %p3020_p0 = scmp.ge.s32.totalorder %s4184_s24, 1  ;;  %p427_p1 = scmp.lt.s32.totalorder %s4184_s24, 3 }
  0x10   : > { %p5264_p2 = scmp.eq.s32.totalorder %s4301_s27, 0  ;;  %s4187_s29 = smov [#allocation7]  }
  0x11   : > { %p4308_p3 = pnand %p3020_p0, %p427_p1  ;;  %s476_s0 = sshll.u32 %s4187_s29, 4  ;;  %s4314_s0 = int_to_ptr.vmem [resolvable:$true] %s476_s0 }
  0x12   : > { %s4188_s30 = smov [#allocation10]   ;;  %s4189_s1 = smov [#allocation13]  }
  0x13   : > { %s5274_s28 = scalar_select %p4308_p3, 1, 0 }
  0x14   : > { %p3619_p4 = pneg %p4308_p3  ;;  %s501_s18 = sshll.u32 %s4188_s30, 4  ;;  %s4322_s18 = int_to_ptr.vmem [resolvable:$true] %s501_s18 }
  0x15   : > { %s528_s20 = sshll.u32 %s4189_s1, 4  ;;  %s5276_s3 = sld [smem:[#allocation31_spill]]  ;;  %s4324_s20 = int_to_ptr.vmem [resolvable:$true] %s528_s20 }
  0x16   : > { %p4318_p5 = pnand %p5264_p2, %p3619_p4 }
  0x18   : > { %p4334_p7 = pneg %p4318_p5 }
  0x1b   : > { %s3814_s23 = scalar_lea.hbm %s5276_s3, 32 }
  0x1c   : > { %p3815_p6 = scmp.ne.s32.totalorder %s5276_s3, %s3814_s23  ;;  %p3821_p10 = scmp.lt.u32.totalorder %s3814_s23, %s5276_s3 }
  0x1e   : > { %p3817_p8 = pnand %p4334_p7, %p3815_p6 }
  0x20   : > { %p3818_p9 = pneg %p3817_p8 }
  0x22   : > { %p3823_p11 = pnand %p3821_p10, %p3818_p9 }
  0x24   : > { %3826 = shalt.err (!%p3823_p11)
}
  0x25   : > { %s3827_s21 = scalar_lea.vmem %s4306_s26, 32  ;;  %p3835_p1 = scmp.lt.s32.totalorder %s4306_s26, %s4306_s26 }
  0x26   : > { %p3828_p12 = scmp.ne.s32.totalorder %s4306_s26, %s3827_s21  ;;  %p3836_p4 = scmp.lt.s32.totalorder %s3827_s21, %s3827_s21 }
  0x28   : > { %p3830_p13 = pnand %p3828_p12, %p4334_p7  ;;  %p3837_p6 = por %p3836_p4, %p3835_p1 }
  0x2a   : > { %p3831_p0 = pneg %p3830_p13 }
  0x2c   : > { %p3838_p8 = pnand %p3837_p6, %p3831_p0 }
  0x2e   : > { %3841 = shalt.err (!%p3838_p8)
}
  0x2f   : > { %3625 = dma.hbm_to_vmem [thread:$0]  (!%p4318_p5), %s5276_s3, 32, %s4306_s26, [#allocation5]  }
  0x30   : > { %s3842_s29 = scalar_lea.hbm %s5247_s5, 64 }
  0x31   : > { %p3843_p9 = scmp.ne.s32.totalorder %s5247_s5, %s3842_s29  ;;  %p3849_p12 = scmp.lt.u32.totalorder %s3842_s29, %s5247_s5 }
  0x33   : > { %p3845_p10 = pnand %p3843_p9, %p4334_p7 }
  0x35   : > { %p3846_p11 = pneg %p3845_p10 }
  0x37   : > { %p3851_p13 = pnand %p3849_p12, %p3846_p11 }
  0x39   : > { %3854 = shalt.err (!%p3851_p13)
}
  0x3a   : > { %s3855_s26 = scalar_lea.vmem %s4314_s0, 64  ;;  %p3863_p6 = scmp.lt.s32.totalorder %s4314_s0, %s4314_s0 }
  0x3b   : > { %p3856_p0 = scmp.ne.s32.totalorder %s4314_s0, %s3855_s26  ;;  %p3864_p8 = scmp.lt.s32.totalorder %s3855_s26, %s3855_s26 }
  0x3d   : > { %p3858_p1 = pnand %p3856_p0, %p4334_p7  ;;  %p3865_p9 = por %p3864_p8, %p3863_p6 }
  0x3f   : > { %p3859_p4 = pneg %p3858_p1 }
  0x41   : > { %p3866_p10 = pnand %p3865_p9, %p3859_p4 }
  0x43   : > { %3869 = shalt.err (!%p3866_p10)
}
  0x44   : > { %3631 = dma.hbm_to_vmem [thread:$0]  (!%p4318_p5), %s5247_s5, 64, %s4314_s0, [#allocation8]  }
  0x45   : > { %s3870_s23 = scalar_lea.hbm %s5250_s8, 16 }
  0x46   : > { %p3871_p11 = scmp.ne.s32.totalorder %s5250_s8, %s3870_s23  ;;  %p3877_p0 = scmp.lt.u32.totalorder %s3870_s23, %s5250_s8 }
  0x48   : > { %p3873_p12 = pnand %p3871_p11, %p4334_p7 }
  0x4a   : > { %p3874_p13 = pneg %p3873_p12 }
  0x4c   : > { %p3879_p1 = pnand %p3877_p0, %p3874_p13 }
  0x4e   : > { %3882 = shalt.err (!%p3879_p1)
}
  0x4f   : > { %s3883_s0 = scalar_lea.vmem %s4322_s18, 16  ;;  %s3890_s26 = scalar_lea.vmem %s4322_s18, 32 }
  0x50   : > { %p3884_p4 = scmp.ne.s32.totalorder %s4322_s18, %s3883_s0  ;;  %p3891_p9 = scmp.lt.s32.totalorder %s4322_s18, %s4322_s18 }
  0x51   : > { %p3892_p10 = scmp.lt.s32.totalorder %s3890_s26, %s3883_s0 }
  0x52   : > { %p3886_p6 = pnand %p3884_p4, %p4334_p7 }
  0x53   : > { %p3893_p11 = por %p3892_p10, %p3891_p9 }
  0x54   : > { %p3887_p8 = pneg %p3886_p6 }
  0x56   : > { %p3894_p12 = pnand %p3893_p11, %p3887_p8 }
  0x58   : > { %3897 = shalt.err (!%p3894_p12)
}
  0x59   : > { %3637 = dma.hbm_to_vmem [thread:$0]  (!%p4318_p5), %s5250_s8, 16, %s4322_s18, [#allocation11]  }
  0x5a   : > { %s3898_s23 = scalar_lea.hbm %s5253_s11, 32 }
  0x5b   : > { %p3899_p13 = scmp.ne.s32.totalorder %s5253_s11, %s3898_s23  ;;  %p3905_p4 = scmp.lt.u32.totalorder %s3898_s23, %s5253_s11 }
  0x5d   : > { %p3901_p0 = pnand %p3899_p13, %p4334_p7 }
  0x5f   : > { %p3902_p1 = pneg %p3901_p0 }
  0x61   : > { %p3907_p6 = pnand %p3905_p4, %p3902_p1 }
  0x63   : > { %3910 = shalt.err (!%p3907_p6)
}
  0x64   : > { %s3911_s18 = scalar_lea.vmem %s4324_s20, 32  ;;  %p3919_p11 = scmp.lt.s32.totalorder %s4324_s20, %s4324_s20 }
  0x65   : > { %p3912_p8 = scmp.ne.s32.totalorder %s4324_s20, %s3911_s18  ;;  %p3920_p12 = scmp.lt.s32.totalorder %s3911_s18, %s3911_s18 }
  0x67   : > { %p3914_p9 = pnand %p3912_p8, %p4334_p7  ;;  %p3921_p13 = por %p3920_p12, %p3919_p11 }
  0x69   : > { %p3915_p10 = pneg %p3914_p9 }
  0x6b   : > { %p3922_p0 = pnand %p3921_p13, %p3915_p10 }
  0x6d   : > { %3925 = shalt.err (!%p3922_p0)
}
  0x6e   : > { %3643 = dma.hbm_to_vmem [thread:$0]  (!%p4318_p5), %s5253_s11, 32, %s4324_s20, [#allocation14]  }
  0x6f   : > { %s4190_s10 = smov [#allocation16]   ;;  %s4191_s24 = smov [#allocation2]  }
  0x70   : > { %s549_s14 = sshll.u32 %s4190_s10, 4  ;;  %s440_s22 = sshll.u32 %s4191_s24, 4  ;;  %s550_s14 = int_to_ptr.vmem [resolvable:$true] %s549_s14  ;;  %s441_s22 = int_to_ptr.vmem [resolvable:$true] %s440_s22 }
  0x71   : > { %s3926_s29 = scalar_lea.hbm %s5255_s13, 640 }
  0x72   : > { %p3927_p1 = scmp.ne.s32.totalorder %s5255_s13, %s3926_s29  ;;  %p3933_p8 = scmp.lt.u32.totalorder %s3926_s29, %s5255_s13 }
  0x74   : > { %p3929_p4 = pnand %p3927_p1, %p4334_p7 }
  0x76   : > { %p3930_p6 = pneg %p3929_p4 }
  0x78   : > { %p3935_p9 = pnand %p3933_p8, %p3930_p6 }
  0x7a   : > { %3938 = shalt.err (!%p3935_p9)
}
  0x7b   : > { %s3939_s20 = scalar_lea.vmem %s550_s14, 640  ;;  %p3947_p13 = scmp.lt.s32.totalorder %s550_s14, %s550_s14 }
  0x7c   : > { %p3940_p10 = scmp.ne.s32.totalorder %s550_s14, %s3939_s20  ;;  %p3948_p0 = scmp.lt.s32.totalorder %s3939_s20, %s3939_s20 }
  0x7e   : > { %p3942_p11 = pnand %p3940_p10, %p4334_p7  ;;  %p3949_p2 = por %p3948_p0, %p3947_p13 }
  0x80   : > { %p3943_p12 = pneg %p3942_p11 }
  0x82   : > { %p3950_p3 = pnand %p3949_p2, %p3943_p12 }
  0x84   : > { %3953 = shalt.err (!%p3950_p3)
}
  0x85   : > { %s5266_s26 = smov 128   ;;  %s5267_s10 = smov 8  }
  0x86   : > { %3649 = dma.hbm_to_vmem [thread:$0]  (!%p4318_p5), %s5255_s13, 640, %s550_s14, [#allocation17], %s5266_s26, %s5266_s26, %s5267_s10  }
  0x87   : > { %s5278_s1 = sld [smem:[#allocation30_spill]] }
  0x8d   : > { %s3954_s21 = scalar_lea.hbm %s5278_s1, 32 }
  0x8e   : > { %p3955_p2 = scmp.ne.s32.totalorder %s5278_s1, %s3954_s21  ;;  %p3961_p4 = scmp.lt.u32.totalorder %s3954_s21, %s5278_s1 }
  0x90   : > { %p3957_p3 = pnand %p3955_p2, %p4334_p7 }
  0x92   : > { %p3958_p1 = pneg %p3957_p3 }
  0x94   : > { %p3963_p6 = pnand %p3961_p4, %p3958_p1 }
  0x96   : > { %3966 = shalt.err (!%p3963_p6)
}
  0x97   : > { %s3967_s24 = scalar_lea.vmem %s441_s22, 32  ;;  %p3975_p11 = scmp.lt.s32.totalorder %s441_s22, %s441_s22 }
  0x98   : > { %p3968_p8 = scmp.ne.s32.totalorder %s441_s22, %s3967_s24  ;;  %p3976_p12 = scmp.lt.s32.totalorder %s3967_s24, %s3967_s24 }
  0x9a   : > { %p3970_p9 = pnand %p3968_p8, %p4334_p7  ;;  %p3977_p13 = por %p3976_p12, %p3975_p11 }
  0x9c   : > { %p3971_p10 = pneg %p3970_p9 }
  0x9e   : > { %p3978_p0 = pnand %p3977_p13, %p3971_p10 }
  0xa0   : > { %3981 = shalt.err (!%p3978_p0)
}
  0xa1   : > { %3622 = dma.hbm_to_vmem [thread:$0]  (!%p4318_p5), %s5278_s1, 32, %s441_s22, [#allocation3]  }
  0xa2   : > { %s4194_s3 = smov [#allocation6]   ;;  %s4195_s29 = smov [#allocation9]  }
  0xa3   : > { %s465_s25 = sshll.u32 %s4194_s3, 4  ;;  %s490_s21 = sshll.u32 %s4195_s29, 4  ;;  %s466_s25 = int_to_ptr.vmem [resolvable:$true] %s465_s25  ;;  %s491_s21 = int_to_ptr.vmem [resolvable:$true] %s490_s21 }
  0xa4   : > { %s3982_s20 = scalar_lea.hbm %s5246_s4, 16 }
  0xa5   : > { %p3983_p2 = scmp.ne.s32.totalorder %s5246_s4, %s3982_s20  ;;  %p3989_p4 = scmp.lt.u32.totalorder %s3982_s20, %s5246_s4 }
  0xa7   : > { %p3985_p3 = pnand %p3983_p2, %p4334_p7 }
  0xa9   : > { %p3986_p1 = pneg %p3985_p3 }
  0xab   : > { %p3991_p6 = pnand %p3989_p4, %p3986_p1 }
  0xad   : > { %3994 = shalt.err (!%p3991_p6)
}
  0xae   : > { %s3995_s22 = scalar_lea.vmem %s466_s25, 16  ;;  %s4002_s23 = scalar_lea.vmem %s466_s25, 32 }
  0xaf   : > { %p3996_p8 = scmp.ne.s32.totalorder %s466_s25, %s3995_s22  ;;  %p4003_p11 = scmp.lt.s32.totalorder %s466_s25, %s466_s25 }
  0xb0   : > { %p4004_p12 = scmp.lt.s32.totalorder %s4002_s23, %s3995_s22 }
  0xb1   : > { %p3998_p9 = pnand %p3996_p8, %p4334_p7 }
  0xb2   : > { %p4005_p13 = por %p4004_p12, %p4003_p11 }
  0xb3   : > { %p3999_p10 = pneg %p3998_p9 }
  0xb5   : > { %p4006_p0 = pnand %p4005_p13, %p3999_p10 }
  0xb7   : > { %4009 = shalt.err (!%p4006_p0)
}
  0xb8   : > { %3628 = dma.hbm_to_vmem [thread:$0]  (!%p4318_p5), %s5246_s4, 16, %s466_s25, [#allocation5]  }
  0xb9   : > { %s4010_s18 = scalar_lea.hbm %s5249_s7, 32 }
  0xba   : > { %p4011_p2 = scmp.ne.s32.totalorder %s5249_s7, %s4010_s18  ;;  %p4017_p4 = scmp.lt.u32.totalorder %s4010_s18, %s5249_s7 }
  0xbc   : > { %p4013_p3 = pnand %p4011_p2, %p4334_p7 }
  0xbe   : > { %p4014_p1 = pneg %p4013_p3 }
  0xc0   : > { %p4019_p6 = pnand %p4017_p4, %p4014_p1 }
  0xc2   : > { %4022 = shalt.err (!%p4019_p6)
}
  0xc3   : > { %s4023_s22 = scalar_lea.vmem %s491_s21, 32  ;;  %p4031_p11 = scmp.lt.s32.totalorder %s491_s21, %s491_s21 }
  0xc4   : > { %p4024_p8 = scmp.ne.s32.totalorder %s491_s21, %s4023_s22  ;;  %p4032_p12 = scmp.lt.s32.totalorder %s4023_s22, %s4023_s22 }
  0xc6   : > { %p4026_p9 = pnand %p4024_p8, %p4334_p7  ;;  %p4033_p13 = por %p4032_p12, %p4031_p11 }
  0xc8   : > { %p4027_p10 = pneg %p4026_p9 }
  0xca   : > { %p4034_p0 = pnand %p4033_p13, %p4027_p10 }
  0xcc   : > { %4037 = shalt.err (!%p4034_p0)
}
  0xcd   : > { %3634 = dma.hbm_to_vmem [thread:$0]  (!%p4318_p5), %s5249_s7, 32, %s491_s21, [#allocation8]  }
  0xce   : > { %s4196_s26 = smov [#allocation12]   ;;  %s4197_s10 = smov [#allocation15]  }
  0xcf   : > { %s511_s3 = sshll.u32 %s4196_s26, 4  ;;  %s539_s29 = sshll.u32 %s4197_s10, 4  ;;  %s512_s3 = int_to_ptr.vmem [resolvable:$true] %s511_s3  ;;  %s540_s29 = int_to_ptr.vmem [resolvable:$true] %s539_s29 }
  0xd0   : > { %s4038_s20 = scalar_lea.hbm %s5251_s9, 256 }
  0xd1   : > { %p4039_p2 = scmp.ne.s32.totalorder %s5251_s9, %s4038_s20  ;;  %p4045_p4 = scmp.lt.u32.totalorder %s4038_s20, %s5251_s9 }
  0xd3   : > { %p4041_p3 = pnand %p4039_p2, %p4334_p7 }
  0xd5   : > { %p4042_p1 = pneg %p4041_p3 }
  0xd7   : > { %p4047_p6 = pnand %p4045_p4, %p4042_p1 }
  0xd9   : > { %4050 = shalt.err (!%p4047_p6)
}
  0xda   : > { %s4051_s21 = scalar_lea.vmem %s512_s3, 256  ;;  %p4059_p11 = scmp.lt.s32.totalorder %s512_s3, %s512_s3 }
  0xdb   : > { %p4052_p8 = scmp.ne.s32.totalorder %s512_s3, %s4051_s21  ;;  %p4060_p12 = scmp.lt.s32.totalorder %s4051_s21, %s4051_s21 }
  0xdd   : > { %p4054_p9 = pnand %p4052_p8, %p4334_p7  ;;  %p4061_p13 = por %p4060_p12, %p4059_p11 }
  0xdf   : > { %p4055_p10 = pneg %p4054_p9 }
  0xe1   : > { %p4062_p0 = pnand %p4061_p13, %p4055_p10 }
  0xe3   : > { %4065 = shalt.err (!%p4062_p0)
}
  0xe4   : > { %s5279_s23 = smov 8   ;;  %s5280_s26 = smov 128  }
  0xe5   : > { %3640 = dma.hbm_to_vmem [thread:$0]  (!%p4318_p5), %s5251_s9, 256, %s512_s3, [#allocation11], %s5280_s26, %s5280_s26, %s5279_s23  }
  0xe6   : > { %s4066_s24 = scalar_lea.hbm %s5254_s12, 16 }
  0xe7   : > { %p4067_p2 = scmp.ne.s32.totalorder %s5254_s12, %s4066_s24  ;;  %p4073_p4 = scmp.lt.u32.totalorder %s4066_s24, %s5254_s12 }
  0xe9   : > { %p4069_p3 = pnand %p4067_p2, %p4334_p7 }
  0xeb   : > { %p4070_p1 = pneg %p4069_p3 }
  0xed   : > { %p4075_p6 = pnand %p4073_p4, %p4070_p1 }
  0xef   : > { %4078 = shalt.err (!%p4075_p6)
}
  0xf0   : > { %s4079_s10 = scalar_lea.vmem %s540_s29, 16  ;;  %s4086_s3 = scalar_lea.vmem %s540_s29, 32 }
  0xf1   : > { %p4080_p8 = scmp.ne.s32.totalorder %s540_s29, %s4079_s10  ;;  %p4087_p11 = scmp.lt.s32.totalorder %s540_s29, %s540_s29 }
  0xf2   : > { %p4088_p12 = scmp.lt.s32.totalorder %s4086_s3, %s4079_s10 }
  0xf3   : > { %p4082_p9 = pnand %p4080_p8, %p4334_p7 }
  0xf4   : > { %p4089_p13 = por %p4088_p12, %p4087_p11 }
  0xf5   : > { %p4083_p10 = pneg %p4082_p9 }
  0xf7   : > { %p4090_p0 = pnand %p4089_p13, %p4083_p10 }
  0xf9   : > { %4093 = shalt.err (!%p4090_p0)
}
  0xfa   : > { %3646 = dma.hbm_to_vmem [thread:$0]  (!%p4318_p5), %s5254_s12, 16, %s540_s29, [#allocation14]  }
  0xfb   : > { %s4198_s18 = smov [#allocation18]   ;;  %s4199_s20 = smov [#allocation19]  }
  0xfc   : > { %s566_s0 = sshll.u32 %s4198_s18, 4  ;;  %s577_s24 = sshll.u32 %s4199_s20, 4  ;;  %s567_s0 = int_to_ptr.vmem [resolvable:$true] %s566_s0  ;;  %s578_s24 = int_to_ptr.vmem [resolvable:$true] %s577_s24 }
  0xfd   : > { %s4094_s25 = scalar_lea.hbm %s5257_s15, 32 }
  0xfe   : > { %p4095_p2 = scmp.ne.s32.totalorder %s5257_s15, %s4094_s25  ;;  %p4101_p4 = scmp.lt.u32.totalorder %s4094_s25, %s5257_s15 }
 0x100   : > { %p4097_p3 = pnand %p4095_p2, %p4334_p7 }
 0x102   : > { %p4098_p1 = pneg %p4097_p3 }
 0x104   : > { %p4103_p6 = pnand %p4101_p4, %p4098_p1 }
 0x106   : > { %4106 = shalt.err (!%p4103_p6)
}
 0x107   : > { %s4107_s29 = scalar_lea.vmem %s567_s0, 32  ;;  %p4115_p11 = scmp.lt.s32.totalorder %s567_s0, %s567_s0 }
 0x108   : > { %p4108_p8 = scmp.ne.s32.totalorder %s567_s0, %s4107_s29  ;;  %p4116_p12 = scmp.lt.s32.totalorder %s4107_s29, %s4107_s29 }
 0x10a   : > { %p4110_p9 = pnand %p4108_p8, %p4334_p7  ;;  %p4117_p13 = por %p4116_p12, %p4115_p11 }
 0x10c   : > { %p4111_p10 = pneg %p4110_p9 }
 0x10e   : > { %p4118_p0 = pnand %p4117_p13, %p4111_p10 }
 0x110   : > { %4121 = shalt.err (!%p4118_p0)
}
 0x111   : > { %3652 = dma.hbm_to_vmem [thread:$0]  (!%p4318_p5), %s5257_s15, 32, %s567_s0, [#allocation17]  }
 0x112   : > { %s4122_s22 = scalar_lea.hbm %s5258_s16, 16 }
 0x113   : > { %p4123_p2 = scmp.ne.s32.totalorder %s5258_s16, %s4122_s22  ;;  %p4129_p4 = scmp.lt.u32.totalorder %s4122_s22, %s5258_s16 }
 0x115   : > { %p4125_p3 = pnand %p4123_p2, %p4334_p7 }
 0x117   : > { %p4126_p1 = pneg %p4125_p3 }
 0x119   : > { %p4131_p6 = pnand %p4129_p4, %p4126_p1 }
 0x11b   : > { %4134 = shalt.err (!%p4131_p6)
}
 0x11c   : > { %s4135_s23 = scalar_lea.vmem %s578_s24, 16  ;;  %s4142_s0 = scalar_lea.vmem %s578_s24, 32 }
 0x11d   : > { %p4136_p8 = scmp.ne.s32.totalorder %s578_s24, %s4135_s23  ;;  %p4143_p11 = scmp.lt.s32.totalorder %s578_s24, %s578_s24 }
 0x11e   : > { %p4144_p12 = scmp.lt.s32.totalorder %s4142_s0, %s4135_s23 }
 0x11f   : > { %p4138_p9 = pnand %p4136_p8, %p4334_p7 }
 0x120   : > { %p4145_p13 = por %p4144_p12, %p4143_p11 }
 0x121   : > { %p4139_p10 = pneg %p4138_p9 }
 0x123   : > { %p4146_p0 = pnand %p4145_p13, %p4139_p10 }
 0x125   : > { %4149 = shalt.err (!%p4146_p0)
}
 0x126   : > { %3655 = dma.hbm_to_vmem [thread:$0]  (!%p4318_p5), %s5258_s16, 16, %s578_s24, [#allocation20]  }
 0x127   : > { %p5281_p2 = scmp.ne.s32.totalorder %s5274_s28, 0 }
 0x128   : > { %p5282_p3 = scmp.eq.s32.totalorder (!%p5281_p2), %s4301_s27, 0 }
 0x129   : > { %598 = sbr.rel (%p5281_p2) target bundleno = 2100 (0x834), region = 88 }
 0x130   : > { %4155 = dma.done.wait (%p5282_p3), [#allocation3], 32   ;;  %p5283_p7 = pmov %p5282_p3 }
 0x131   : > { %p5284_p1 = pmov %p5282_p3 }
 0x132   : > { %4157 = vsyncadd (%p5283_p7), [#allocation3], 4294967264 }
 0x133   : > { %4159 = dma.done.wait (%p5284_p1), [#allocation5], 48   ;;  %p5285_p4 = pmov %p5284_p1 }
 0x134   : > { %p5286_p6 = pmov %p5284_p1 }
 0x135   : > { %4161 = vsyncadd (%p5285_p4), [#allocation5], 4294967248 }
 0x136   : > { %4163 = dma.done.wait (%p5286_p6), [#allocation8], 96   ;;  %p5287_p5 = pmov %p5284_p1 }
 0x137   : > { %p5288_p8 = pmov %p5284_p1 }
 0x138   : > { %4165 = vsyncadd (%p5287_p5), [#allocation8], 4294967200 }
 0x139   : > { %4167 = dma.done.wait (%p5288_p8), [#allocation11], 272   ;;  %p5289_p9 = pmov %p5284_p1 }
 0x13a   : > { %p5290_p10 = pmov %p5284_p1 }
 0x13b   : > { %4169 = vsyncadd (%p5289_p9), [#allocation11], 4294967024 }
 0x13c   : > { %4171 = dma.done.wait (%p5290_p10), [#allocation14], 48   ;;  %p5291_p11 = pmov %p5284_p1 }
 0x13d   : > { %p5292_p12 = pmov %p5284_p1 }
 0x13e   : > { %4173 = vsyncadd (%p5291_p11), [#allocation14], 4294967248 }
 0x13f   : > { %4175 = dma.done.wait (%p5292_p12), [#allocation17], 672   ;;  %p5293_p13 = pmov %p5284_p1 }
 0x140   : > { %p5294_p0 = pmov %p5284_p1 }
 0x141   : > { %4177 = vsyncadd (%p5293_p13), [#allocation17], 4294966624 }
 0x142   : > { %4179 = dma.done.wait (%p5294_p0), [#allocation20], 16   ;;  %p5295_p2 = pmov %p5294_p0 }
 0x143   : > { %p694_p3 = scmp.lt.s32.totalorder %s4301_s27, 1  ;;  %s5296_s24 = sld [smem:[#allocation29_spill]]  ;;  %vm934_vm0 = vcmask 31744   ;;  %v784_v3 = vlaneseq  ;;  %v4200_v15 = vmov 1966171168   ;;  %vm938_vm1 = vcmask 1041408  }
 0x144   : > { %4181 = vsyncadd (%p5295_p2), [#allocation20], 4294967280  ;;  %v782_v16 = vunpack.c.l.s4 %v4200_v15  ;;  %v3050_v41 = vld.sshfl [vmem:[#allocation2] sm:$0x11 pattern:$0x75316420] }
 0x145   : > { %s5301_s27 = smov (!%p694_p3, %s4301_s27), 1  ;;  %v785_v22 = vshrl.u32 %v784_v3, 7  ;;  %v780_v55 = vcombine.high %v3050_v41, %v3050_v41  ;;  %v770_v58 = vld [vmem:[#allocation4] sm:$0x3]  ;;  %v4201_v59 = vmov 0.0   ;;  %vm4202_vm2 = vmmov 0  }
 0x146   : > { %s3215_s28 = sshll.u32 %s5301_s27, 7  ;;  %s3570_s20 = smul.u32 1280, %s5301_s27  ;;  %v783_v35 = vunpack.c.0.s8 %v782_v16  ;;  %3396 = vmatprep.subr.bf16.mxu1 %v4201_v59  ;;  %v940_v60 = vsel %vm938_vm1, %v770_v58, 0  ;;  %3398 = vmatprep.mubr.msk.bf16.mxu1 %vm4202_vm2, %v4201_v59  ;;  %vm1064_vm3 = vcmask 7168   ;;  %vm1113_vm4 = vcmask 1040384  }
 0x147   : > { %3397 = vmatpush3.bf16.msra.mxu1 %v940_v60  ;;  %vm2050_vm5 = vcmask 1043456   ;;  %vm2051_vm6 = vcmask 1044480   ;;  %s5297_s10 = sld [smem:[#allocation32_spill]]  ;;  %vm2001_vm7 = vcmask 72704   ;;  %s5298_s0 = sld [smem:[#allocation33_spill]]  ;;  %vm2537_vm8 = vcmask 293888  }
 0x148   : > { %s4629_s25 = scalar_lea.vmem %s5259_s17, %s3570_s20  ;;  %v786_v51 = vsub.s32 %v783_v35, %v785_v22  ;;  %v3731_v35 = vld [vmem:[%s5244_s2 + $0x40] sm:$0xff]  }
 0x149   : > { %s4610_s18 = scalar_lea.vmem %s5296_s24, %s3215_s28 }
 0x14a   : > { %v4613_v0 = vld [vmem:[%s4610_s18 + $0x40] sm:$0xff]   ;;  %v4619_v2 = vld [vmem:[%s4610_s18 + $0x48] sm:$0xff]   ;;  %v4635_v10 = vld [vmem:[%s4610_s18 + $0x50] sm:$0xff]   ;;  %v794_v56 = vrot.slane %v780_v55, %v786_v51  ;;  %v787_v57 = vrot.slane %v3050_v41, %v786_v51 }
 0x14b   : > { %v4616_v1 = vld [vmem:[%s4610_s18] sm:$0xff]   ;;  %v2798_v4 = vunpack.c.l.bf16 %v4613_v0  ;;  %v2799_v5 = vunpack.c.h.bf16 %v4613_v0  ;;  %v4624_v6 = vld [vmem:[%s4610_s18 + $0x8] sm:$0xff]   ;;  %v2800_v9 = vunpack.c.l.bf16 %v4619_v2  ;;  %3216 = vmatprep.subr.bf16.mxu0 %v4613_v0  ;;  %v2801_v11 = vunpack.c.h.bf16 %v4619_v2  ;;  %v4646_v14 = vld [vmem:[%s4610_s18 + $0x10] sm:$0xff]  }
 0x14c   : > { %v2782_v7 = vunpack.c.l.bf16 %v4616_v1  ;;  %v2783_v8 = vunpack.c.h.bf16 %v4616_v1  ;;  %v2784_v12 = vunpack.c.l.bf16 %v4624_v6  ;;  %v2785_v13 = vunpack.c.h.bf16 %v4624_v6  ;;  %3217 = vmatpush3.bf16.msra.mxu0 %v4616_v1  ;;  %v4658_v19 = vld [vmem:[%s4610_s18 + $0x58] sm:$0xff]   ;;  %v4664_v21 = vld [vmem:[%s4610_s18 + $0x60] sm:$0xff]   ;;  %v4680_v27 = vld [vmem:[%s4610_s18 + $0x68] sm:$0xff]   ;;  %925 = vmatprep.mubr.bf16.mxu0 %v794_v56 }
 0x14d   : > { %2830 = vst.msk [vmem:[%s4629_s25 + $0x2a0] sm:$0xff] %vm934_vm0, %v2798_v4  ;;  %2831 = vst.msk [vmem:[%s4629_s25 + $0x2c8] sm:$0xff] %vm934_vm0, %v2799_v5  ;;  %v2802_v17 = vunpack.c.l.bf16 %v4635_v10  ;;  %v2803_v18 = vunpack.c.h.bf16 %v4635_v10  ;;  %v4661_v20 = vld [vmem:[%s4610_s18 + $0x18] sm:$0xff]   ;;  %3218 = vmatprep.subr.bf16.mxu0 %v4619_v2  ;;  %v2786_v23 = vunpack.c.l.bf16 %v4646_v14  ;;  %v2787_v24 = vunpack.c.h.bf16 %v4646_v14  ;;  %v4677_v26 = vld [vmem:[%s4610_s18 + $0x20] sm:$0xff]  }
 0x14e   : > { %2814 = vst.msk [vmem:[%s4629_s25 + $0x20] sm:$0xff] %vm934_vm0, %v2782_v7  ;;  %2815 = vst.msk [vmem:[%s4629_s25 + $0x48] sm:$0xff] %vm934_vm0, %v2783_v8  ;;  %v2804_v25 = vunpack.c.l.bf16 %v4658_v19  ;;  %v2805_v28 = vunpack.c.h.bf16 %v4658_v19  ;;  %v2788_v29 = vunpack.c.l.bf16 %v4661_v20  ;;  %v2789_v30 = vunpack.c.h.bf16 %v4661_v20  ;;  %v4690_v31 = vld [vmem:[%s4610_s18 + $0x28] sm:$0xff]   ;;  %v4701_v34 = vld [vmem:[%s4610_s18 + $0x70] sm:$0xff]  }
 0x14f   : > { %2832 = vst.msk [vmem:[%s4629_s25 + $0x2f0] sm:$0xff] %vm934_vm0, %v2800_v9  ;;  %2833 = vst.msk [vmem:[%s4629_s25 + $0x318] sm:$0xff] %vm934_vm0, %v2801_v11  ;;  %v2806_v32 = vunpack.c.l.bf16 %v4664_v21  ;;  %v2807_v33 = vunpack.c.h.bf16 %v4664_v21  ;;  %v2790_v36 = vunpack.c.l.bf16 %v4677_v26  ;;  %v2791_v37 = vunpack.c.h.bf16 %v4677_v26  ;;  %v4714_v39 = vld [vmem:[%s4610_s18 + $0x30] sm:$0xff]   ;;  %v4717_v40 = vld [vmem:[%s4610_s18 + $0x78] sm:$0xff]  }
 0x150   : > { %2816 = vst.msk [vmem:[%s4629_s25 + $0x70] sm:$0xff] %vm934_vm0, %v2784_v12  ;;  %2817 = vst.msk [vmem:[%s4629_s25 + $0x98] sm:$0xff] %vm934_vm0, %v2785_v13  ;;  %3219 = vmatpush3.bf16.msra.mxu0 %v4624_v6  ;;  %v2808_v38 = vunpack.c.l.bf16 %v4680_v27  ;;  %v2809_v42 = vunpack.c.h.bf16 %v4680_v27  ;;  %v2792_v43 = vunpack.c.l.bf16 %v4690_v31  ;;  %v2793_v44 = vunpack.c.h.bf16 %v4690_v31  ;;  %v4728_v45 = vld [vmem:[%s4610_s18 + $0x38] sm:$0xff]   ;;  %v3723_v7 = vld [vmem:[%s5244_s2] sm:$0xff]  }
 0x151   : > { %2834 = vst.msk [vmem:[%s4629_s25 + $0x340] sm:$0xff] %vm934_vm0, %v2802_v17  ;;  %2835 = vst.msk [vmem:[%s4629_s25 + $0x368] sm:$0xff] %vm934_vm0, %v2803_v18  ;;  %3220 = vmatprep.subr.bf16.mxu0 %v4635_v10  ;;  %v2810_v46 = vunpack.c.l.bf16 %v4701_v34  ;;  %v2811_v47 = vunpack.c.h.bf16 %v4701_v34  ;;  %v2794_v48 = vunpack.c.l.bf16 %v4714_v39  ;;  %v2795_v49 = vunpack.c.h.bf16 %v4714_v39  ;;  %v771_v8 = vld [vmem:[#allocation6] sm:$0x1] }
 0x152   : > { %2818 = vst.msk [vmem:[%s4629_s25 + $0xc0] sm:$0xff] %vm934_vm0, %v2786_v23  ;;  %2819 = vst.msk [vmem:[%s4629_s25 + $0xe8] sm:$0xff] %vm934_vm0, %v2787_v24  ;;  %v2812_v50 = vunpack.c.l.bf16 %v4717_v40  ;;  %v2813_v52 = vunpack.c.h.bf16 %v4717_v40  ;;  %v2796_v53 = vunpack.c.l.bf16 %v4728_v45  ;;  %v2797_v54 = vunpack.c.h.bf16 %v4728_v45  ;;  %v3724_v24 = vld [vmem:[%s5244_s2 + $0x8] sm:$0xff]   ;;  %v3735_v41 = vld [vmem:[%s5244_s2 + $0x60] sm:$0xff]  }
 0x153   : > { %2836 = vst.msk [vmem:[%s4629_s25 + $0x390] sm:$0xff] %vm934_vm0, %v2804_v25  ;;  %2837 = vst.msk [vmem:[%s4629_s25 + $0x3b8] sm:$0xff] %vm934_vm0, %v2805_v28  ;;  %v4203_v17 = vmov 0   ;;  %v3725_v25 = vld [vmem:[%s5244_s2 + $0x10] sm:$0xff]   ;;  %v3726_v28 = vld [vmem:[%s5244_s2 + $0x18] sm:$0xff]  }
 0x154   : > { %2820 = vst.msk [vmem:[%s4629_s25 + $0x110] sm:$0xff] %vm934_vm0, %v2788_v29  ;;  %2821 = vst.msk [vmem:[%s4629_s25 + $0x138] sm:$0xff] %vm934_vm0, %v2789_v30  ;;  %3221 = vmatpush3.bf16.msra.mxu0 %v4646_v14  ;;  %v1115_v18 = vsel %vm1113_vm4, 65535, %v4203_v17  ;;  %v3727_v29 = vld [vmem:[%s5244_s2 + $0x20] sm:$0xff]   ;;  %v3728_v30 = vld [vmem:[%s5244_s2 + $0x28] sm:$0xff]  }
 0x155   : > { %2838 = vst.msk [vmem:[%s4629_s25 + $0x3e0] sm:$0xff] %vm934_vm0, %v2806_v32  ;;  %2839 = vst.msk [vmem:[%s4629_s25 + $0x408] sm:$0xff] %vm934_vm0, %v2807_v33  ;;  %3222 = vmatprep.subr.bf16.mxu0 %v4658_v19  ;;  %v3729_v32 = vld [vmem:[%s5244_s2 + $0x30] sm:$0xff]   ;;  %v3730_v33 = vld [vmem:[%s5244_s2 + $0x38] sm:$0xff]  }
 0x156   : > { %2822 = vst.msk [vmem:[%s4629_s25 + $0x160] sm:$0xff] %vm934_vm0, %v2790_v36  ;;  %2823 = vst.msk [vmem:[%s4629_s25 + $0x188] sm:$0xff] %vm934_vm0, %v2791_v37  ;;  %v3732_v36 = vld [vmem:[%s5244_s2 + $0x48] sm:$0xff]   ;;  %v3733_v37 = vld [vmem:[%s5244_s2 + $0x50] sm:$0xff]  }
 0x157   : > { %2840 = vst.msk [vmem:[%s4629_s25 + $0x430] sm:$0xff] %vm934_vm0, %v2808_v38  ;;  %2841 = vst.msk [vmem:[%s4629_s25 + $0x458] sm:$0xff] %vm934_vm0, %v2809_v42  ;;  %v3734_v38 = vld [vmem:[%s5244_s2 + $0x58] sm:$0xff]   ;;  %v3736_v42 = vld [vmem:[%s5244_s2 + $0x68] sm:$0xff]  }
 0x158   : > { %2824 = vst.msk [vmem:[%s4629_s25 + $0x1b0] sm:$0xff] %vm934_vm0, %v2792_v43  ;;  %2825 = vst.msk [vmem:[%s4629_s25 + $0x1d8] sm:$0xff] %vm934_vm0, %v2793_v44  ;;  %3223 = vmatpush3.bf16.msra.mxu0 %v4661_v20  ;;  %v3737_v43 = vld [vmem:[%s5244_s2 + $0x70] sm:$0xff]  }
 0x159   : > { %2842 = vst.msk [vmem:[%s4629_s25 + $0x480] sm:$0xff] %vm934_vm0, %v2810_v46  ;;  %2843 = vst.msk [vmem:[%s4629_s25 + $0x4a8] sm:$0xff] %vm934_vm0, %v2811_v47  ;;  %3224 = vmatprep.subr.bf16.mxu0 %v4664_v21  ;;  %v3100_v44 = vld.sshfl [vmem:[#allocation7] sm:$0x33 pattern:$0x76325410] }
 0x15a   : > { %2826 = vst.msk [vmem:[%s4629_s25 + $0x200] sm:$0xff] %vm934_vm0, %v2794_v48  ;;  %2827 = vst.msk [vmem:[%s4629_s25 + $0x228] sm:$0xff] %vm934_vm0, %v2795_v49  ;;  %v3738_v46 = vld [vmem:[%s5244_s2 + $0x78] sm:$0xff]   ;;  %v1355_v47 = vcombine.high %v3100_v44, %v3100_v44  ;;  %v1345_v48 = vld [vmem:[#allocation9] sm:$0x3] }
 0x15b   : > { %2844 = vst.msk [vmem:[%s4629_s25 + $0x4d0] sm:$0xff] %vm934_vm0, %v2812_v50  ;;  %2845 = vst.msk [vmem:[%s4629_s25 + $0x4f8] sm:$0xff] %vm934_vm0, %v2813_v52  ;;  %v1409_v49 = vsel %vm938_vm1, %v1345_v48, 0 }
 0x15c   : > { %2828 = vst.msk [vmem:[%s4629_s25 + $0x250] sm:$0xff] %vm934_vm0, %v2796_v53  ;;  %2829 = vst.msk [vmem:[%s4629_s25 + $0x278] sm:$0xff] %vm934_vm0, %v2797_v54  ;;  %3225 = vmatpush3.bf16.msra.mxu0 %v4677_v26 }
 0x15d   : > { %3226 = vmatprep.subr.bf16.mxu0 %v4680_v27 }
 0x160   : > { %3227 = vmatpush3.bf16.msra.mxu0 %v4690_v31 }
 0x161   : > { %3228 = vmatprep.subr.bf16.mxu0 %v4701_v34 }
 0x164   : > { %3229 = vmatpush3.bf16.msra.mxu0 %v4714_v39 }
 0x165   : > { %3230 = vmatprep.subr.bf16.mxu0 %v4717_v40 }
 0x168   : > { %3231 = vmatpush3.bf16.msra.mxu0 %v4728_v45 }
 0x169   : > { %3298 = vmatprep.subr.bf16.mxu0 %v4613_v0 }
 0x16b   : > { %926 = vmatmul.mubr.bf16.vlgmr.msra.gmra.mrb[0].mxu0 %v787_v57 }
 0x16c   : > { %3299 = vmatpush3.bf16.msra.mxu0 %v4616_v1 }
 0x16d   : > { %3300 = vmatprep.subr.bf16.mxu0 %v4619_v2 }
 0x170   : > { %3301 = vmatpush3.bf16.msra.mxu0 %v4624_v6 }
 0x171   : > { %3302 = vmatprep.subr.bf16.mxu0 %v4635_v10 }
 0x174   : > { %3303 = vmatpush3.bf16.msra.mxu0 %v4646_v14 }
 0x175   : > { %3304 = vmatprep.subr.bf16.mxu0 %v4658_v19 }
 0x178   : > { %3305 = vmatpush3.bf16.msra.mxu0 %v4661_v20 }
 0x179   : > { %3306 = vmatprep.subr.bf16.mxu0 %v4664_v21 }
 0x17c   : > { %3307 = vmatpush3.bf16.msra.mxu0 %v4677_v26 }
 0x17d   : > { %3308 = vmatprep.subr.bf16.mxu0 %v4680_v27 }
 0x180   : > { %3309 = vmatpush3.bf16.msra.mxu0 %v4690_v31 }
 0x181   : > { %3310 = vmatprep.subr.bf16.mxu0 %v4701_v34 }
 0x184   : > { %3311 = vmatpush3.bf16.msra.mxu0 %v4714_v39 }
 0x185   : > { %3312 = vmatprep.subr.bf16.mxu0 %v4717_v40 }
 0x188   : > { %3313 = vmatpush3.bf16.msra.mxu0 %v4728_v45 }
 0x189   : > { %3476 = vmatprep.subr.bf16.mxu0 %v4201_v59 }
 0x23e   : > { %v3232_v61 = vpop.f32.mrb[0].mxu0 }
 0x23f   : > { %v3233_v62 = vpop.f32.mrb[1].mxu0 }
 0x240   : > { %v3234_v63 = vadd.f32 %v3233_v62, %v3232_v61  ;;  %v3235_v3 = vpop.f32.mrb[2].mxu0 }
 0x241   : > { %v3236_v4 = vpop.f32.mrb[3].mxu0 }
 0x242   : > { %v933_v5 = vpack.c.bf16 %v3234_v63, %v3234_v63 }
 0x244   : > { %3399 = vmatmul.mubr.msk.bf16.vlgmr.msra.gmra.mrb[0].mxu1 %vm934_vm0, %v933_v5 }
 0x245   : > { %3404 = vmatprep.mubr.msk.bf16.mxu1 %vm1064_vm3, %v3723_v7 }
 0x317   : > { %v976_v9 = vpop.f32.mrb[0].mxu1 }
 0x318   : > { %v977_v11 = vadd.f32 %v976_v9, %v771_v8  ;;  %v3400_v12 = vpop.f32.mrb[1].mxu1 }
 0x319   : > { %v979_v13 = vpop.f32.mrb[2].mxu1 }
 0x31a   : > { %v982_v15 = vmax.f32 %v977_v11, 0.0  ;;  %v3401_v16 = vpop.f32.mrb[3].mxu1 }
 0x31c   : > { %v983_v22 = vpack.c.bf16 %v982_v15, %v982_v15 }
 0x31e   : > { %v1117_v23 = vand.u32 %v1115_v18, %v983_v22 }
 0x320   : > { %3402 = vmatprep.subr.bf16.mxu1 %v1117_v23 }
 0x321   : > { %3403 = vmatpush3.bf16.msra.mxu1 %v1117_v23 }
 0x322   : > { %3257 = vmatprep.subr.bf16.mxu1 %v4613_v0 }
 0x324   : > { %3405 = vmatmul.mubr.msk.bf16.vlgmr.msra.gmra.mrb[4].mxu1 %vm1064_vm3, %v3724_v24 }
 0x325   : > { %3408 = vmatprep.mubr.msk.bf16.mxu1 %vm1064_vm3, %v3725_v25  ;;  %3258 = vmatpush3.bf16.msra.mxu1 %v4616_v1 }
 0x326   : > { %3259 = vmatprep.subr.bf16.mxu1 %v4619_v2 }
 0x329   : > { %3260 = vmatpush3.bf16.msra.mxu1 %v4624_v6 }
 0x32a   : > { %3261 = vmatprep.subr.bf16.mxu1 %v4635_v10 }
 0x32c   : > { %3409 = vmatmul.mubr.msk.bf16.gmra.mrb[8].mxu1 %vm1064_vm3, %v3726_v28 }
 0x32d   : > { %3412 = vmatprep.mubr.msk.bf16.mxu1 %vm1064_vm3, %v3727_v29  ;;  %3262 = vmatpush3.bf16.msra.mxu1 %v4646_v14 }
 0x32e   : > { %3263 = vmatprep.subr.bf16.mxu1 %v4658_v19 }
 0x331   : > { %3264 = vmatpush3.bf16.msra.mxu1 %v4661_v20 }
 0x332   : > { %3265 = vmatprep.subr.bf16.mxu1 %v4664_v21 }
 0x334   : > { %3413 = vmatmul.mubr.msk.bf16.gmra.mrb[12].mxu1 %vm1064_vm3, %v3728_v30 }
 0x335   : > { %3416 = vmatprep.mubr.msk.bf16.mxu1 %vm1064_vm3, %v3729_v32  ;;  %3266 = vmatpush3.bf16.msra.mxu1 %v4677_v26 }
 0x336   : > { %3267 = vmatprep.subr.bf16.mxu1 %v4680_v27 }
 0x339   : > { %3268 = vmatpush3.bf16.msra.mxu1 %v4690_v31 }
 0x33a   : > { %3269 = vmatprep.subr.bf16.mxu1 %v4701_v34 }
 0x33c   : > { %3417 = vmatmul.mubr.msk.bf16.gmra.mrb[16].mxu1 %vm1064_vm3, %v3730_v33 }
 0x33d   : > { %3420 = vmatprep.mubr.msk.bf16.mxu1 %vm1064_vm3, %v3731_v35  ;;  %3270 = vmatpush3.bf16.msra.mxu1 %v4714_v39 }
 0x33e   : > { %3271 = vmatprep.subr.bf16.mxu1 %v4717_v40 }
 0x341   : > { %3272 = vmatpush3.bf16.msra.mxu1 %v4728_v45 }
 0x342   : > { %3436 = vmatprep.subr.bf16.mxu1 %v4201_v59 }
 0x344   : > { %3421 = vmatmul.mubr.msk.bf16.gmra.mrb[20].mxu1 %vm1064_vm3, %v3732_v36 }
 0x345   : > { %3424 = vmatprep.mubr.msk.bf16.mxu1 %vm1064_vm3, %v3733_v37 }
 0x34c   : > { %3425 = vmatmul.mubr.msk.bf16.gmra.mrb[24].mxu1 %vm1064_vm3, %v3734_v38  ;;  %v3739_v38 = vld [vmem:[%s5248_s6] sm:$0xff]  }
 0x34d   : > { %3428 = vmatprep.mubr.msk.bf16.mxu1 %vm1064_vm3, %v3735_v41  ;;  %v3754_v41 = vld [vmem:[#allocation12 + $0x4] ss:$8 sps:$4 sm:$0x1f]  }
 0x34e   : > { %1855 = vmatprep.mubr.bf16.mxu0 %v3754_v41 }
 0x354   : > { %3429 = vmatmul.mubr.msk.bf16.gmra.mrb[28].mxu1 %vm1064_vm3, %v3736_v42  ;;  %v3752_v42 = vld [vmem:[#allocation12] ss:$8 sps:$4 sm:$0x1f]  }
 0x355   : > { %3432 = vmatprep.mubr.msk.bf16.mxu1 %vm1064_vm3, %v3737_v43  ;;  %1856 = vmatmul.mubr.bf16.vlgmr.msra.gmra.mrb[4].mxu0 %v3752_v42  ;;  %v3101_v43 = vld [vmem:[#allocation10] ss:$0 sm:$0xff] }
 0x356   : > { %3478 = vmatprep.mubr.msk.bf16.mxu0 %vm4202_vm2, %v4201_v59 }
 0x35c   : > { %3433 = vmatmul.mubr.msk.bf16.gmra.mrb[32].mxu1 %vm1064_vm3, %v3738_v46 }
 0x35d   : > { %1390 = vmatprep.mubr.bf16.mxu1 %v1355_v47 }
 0x364   : > { %1391 = vmatmul.mubr.bf16.vlgmr.msra.gmra.mrb[36].mxu1 %v3100_v44 }
 0x365   : > { %3438 = vmatprep.mubr.msk.bf16.mxu1 %vm4202_vm2, %v4201_v59  ;;  %3437 = vmatpush3.bf16.msra.mxu1 %v1409_v49 }
 0x3f7   : > { %v3406_v50 = vpop.f32.mrb[4].mxu1 }
 0x3f8   : > { %1282 = vst [vmem:[%s4629_s25 + $0x50] sm:$0xff] %v3406_v50  ;;  %v1153_v51 = vpop.f32.mrb[5].mxu1 }
 0x3f9   : > { %1280 = vst [vmem:[%s4629_s25] sm:$0xff] %v1153_v51  ;;  %v3407_v52 = vpop.f32.mrb[6].mxu1 }
 0x3fa   : > { %1283 = vst [vmem:[%s4629_s25 + $0x78] sm:$0xff] %v3407_v52  ;;  %v1156_v53 = vpop.f32.mrb[7].mxu1 }
 0x3fb   : > { %1281 = vst [vmem:[%s4629_s25 + $0x28] sm:$0xff] %v1156_v53  ;;  %v3740_v53 = vld [vmem:[%s5248_s6 + $0x8] sm:$0xff]  }
 0x3ff   : > { %v3410_v54 = vpop.f32.mrb[8].mxu1 }
 0x400   : > { %1286 = vst [vmem:[%s4629_s25 + $0xf0] sm:$0xff] %v3410_v54  ;;  %v1169_v55 = vpop.f32.mrb[9].mxu1  ;;  %v3741_v54 = vld [vmem:[%s5248_s6 + $0x10] sm:$0xff]  }
 0x401   : > { %1284 = vst [vmem:[%s4629_s25 + $0xa0] sm:$0xff] %v1169_v55  ;;  %v3411_v56 = vpop.f32.mrb[10].mxu1  ;;  %v3742_v55 = vld [vmem:[%s5248_s6 + $0x18] sm:$0xff]  }
 0x402   : > { %1287 = vst [vmem:[%s4629_s25 + $0x118] sm:$0xff] %v3411_v56  ;;  %v1172_v57 = vpop.f32.mrb[11].mxu1  ;;  %v3743_v56 = vld [vmem:[%s5248_s6 + $0x20] sm:$0xff]  }
 0x403   : > { %1285 = vst [vmem:[%s4629_s25 + $0xc8] sm:$0xff] %v1172_v57 }
 0x407   : > { %v3414_v58 = vpop.f32.mrb[12].mxu1 }
 0x408   : > { %1290 = vst [vmem:[%s4629_s25 + $0x190] sm:$0xff] %v3414_v58  ;;  %v1185_v60 = vpop.f32.mrb[13].mxu1 }
 0x409   : > { %1288 = vst [vmem:[%s4629_s25 + $0x140] sm:$0xff] %v1185_v60  ;;  %v3415_v61 = vpop.f32.mrb[14].mxu1 }
 0x40a   : > { %1291 = vst [vmem:[%s4629_s25 + $0x1b8] sm:$0xff] %v3415_v61  ;;  %v1188_v62 = vpop.f32.mrb[15].mxu1 }
 0x40b   : > { %1289 = vst [vmem:[%s4629_s25 + $0x168] sm:$0xff] %v1188_v62 }
 0x40f   : > { %v3418_v63 = vpop.f32.mrb[16].mxu1 }
 0x410   : > { %1294 = vst [vmem:[%s4629_s25 + $0x230] sm:$0xff] %v3418_v63  ;;  %v1201_v3 = vpop.f32.mrb[17].mxu1 }
 0x411   : > { %1292 = vst [vmem:[%s4629_s25 + $0x1e0] sm:$0xff] %v1201_v3  ;;  %v3419_v4 = vpop.f32.mrb[18].mxu1  ;;  %v1811_v3 = vld [vmem:[#allocation13] sm:$0x3] }
 0x412   : > { %1295 = vst [vmem:[%s4629_s25 + $0x258] sm:$0xff] %v3419_v4  ;;  %v1204_v5 = vpop.f32.mrb[19].mxu1 }
 0x413   : > { %1293 = vst [vmem:[%s4629_s25 + $0x208] sm:$0xff] %v1204_v5 }
 0x417   : > { %v3422_v7 = vpop.f32.mrb[20].mxu1 }
 0x418   : > { %1298 = vst [vmem:[%s4629_s25 + $0x2d0] sm:$0xff] %v3422_v7  ;;  %v1217_v8 = vpop.f32.mrb[21].mxu1  ;;  %v1875_v7 = vsel %vm938_vm1, %v1811_v3, 0 }
 0x419   : > { %1296 = vst [vmem:[%s4629_s25 + $0x280] sm:$0xff] %v1217_v8  ;;  %v3423_v9 = vpop.f32.mrb[22].mxu1  ;;  %3477 = vmatpush3.bf16.msra.mxu0 %v1875_v7 }
 0x41a   : > { %1299 = vst [vmem:[%s4629_s25 + $0x2f8] sm:$0xff] %v3423_v9  ;;  %v1220_v11 = vpop.f32.mrb[23].mxu1  ;;  %v2287_v9 = vld [vmem:[#allocation18] sm:$0x3] }
 0x41b   : > { %1297 = vst [vmem:[%s4629_s25 + $0x2a8] sm:$0xff] %v1220_v11  ;;  %v2391_v11 = vsel %vm938_vm1, %v2287_v9, 0 }
 0x41f   : > { %v3426_v12 = vpop.f32.mrb[24].mxu1 }
 0x420   : > { %1302 = vst [vmem:[%s4629_s25 + $0x370] sm:$0xff] %v3426_v12  ;;  %v1233_v13 = vpop.f32.mrb[25].mxu1 }
 0x421   : > { %1300 = vst [vmem:[%s4629_s25 + $0x320] sm:$0xff] %v1233_v13  ;;  %v3427_v15 = vpop.f32.mrb[26].mxu1 }
 0x422   : > { %1303 = vst [vmem:[%s4629_s25 + $0x398] sm:$0xff] %v3427_v15  ;;  %v1236_v16 = vpop.f32.mrb[27].mxu1 }
 0x423   : > { %1301 = vst [vmem:[%s4629_s25 + $0x348] sm:$0xff] %v1236_v16 }
 0x427   : > { %v3430_v17 = vpop.f32.mrb[28].mxu1 }
 0x428   : > { %1306 = vst [vmem:[%s4629_s25 + $0x410] sm:$0xff] %v3430_v17  ;;  %v1249_v18 = vpop.f32.mrb[29].mxu1  ;;  %v3314_v60 = vpop.f32.mrb[4].mxu0 }
 0x429   : > { %1304 = vst [vmem:[%s4629_s25 + $0x3c0] sm:$0xff] %v1249_v18  ;;  %v3431_v22 = vpop.f32.mrb[30].mxu1  ;;  %v3315_v61 = vpop.f32.mrb[5].mxu0 }
 0x42a   : > { %1307 = vst [vmem:[%s4629_s25 + $0x438] sm:$0xff] %v3431_v22  ;;  %v1252_v23 = vpop.f32.mrb[31].mxu1  ;;  %v3317_v62 = vpop.f32.mrb[6].mxu0  ;;  %v3316_v4 = vadd.f32 %v3315_v61, %v3314_v60  ;;  %v3137_v60 = vld [vmem:[#allocation15] ss:$0 sm:$0xff] }
 0x42b   : > { %1305 = vst [vmem:[%s4629_s25 + $0x3e8] sm:$0xff] %v1252_v23  ;;  %v3318_v63 = vpop.f32.mrb[7].mxu0 }
 0x42c   : > { %v3319_v5 = vadd.f32 %v3318_v63, %v3317_v62 }
 0x42e   : > { %v1864_v8 = vpack.c.bf16 %v3319_v5, %v3316_v4 }
 0x42f   : > { %v3434_v24 = vpop.f32.mrb[32].mxu1 }
 0x430   : > { %1310 = vst [vmem:[%s4629_s25 + $0x4b0] sm:$0xff] %v3434_v24  ;;  %v1265_v25 = vpop.f32.mrb[33].mxu1  ;;  %3479 = vmatmul.mubr.msk.bf16.vlgmr.msra.gmra.mrb[8].mxu0 %vm934_vm0, %v1864_v8  ;;  %v4204_v8 = vmov 65535  }
 0x431   : > { %1308 = vst [vmem:[%s4629_s25 + $0x460] sm:$0xff] %v1265_v25  ;;  %v3435_v28 = vpop.f32.mrb[34].mxu1  ;;  %v2052_v9 = vsel %vm2050_vm5, 4294967295, %v4204_v8 }
 0x432   : > { %1311 = vst [vmem:[%s4629_s25 + $0x4d8] sm:$0xff] %v3435_v28  ;;  %v1268_v29 = vpop.f32.mrb[35].mxu1 }
 0x433   : > { %1309 = vst [vmem:[%s4629_s25 + $0x488] sm:$0xff] %v1268_v29 }
 0x437   : > { %v3273_v30 = vpop.f32.mrb[36].mxu1 }
 0x438   : > { %v3274_v32 = vpop.f32.mrb[37].mxu1 }
 0x439   : > { %v3275_v33 = vadd.f32 %v3274_v32, %v3273_v30  ;;  %v3276_v35 = vpop.f32.mrb[38].mxu1 }
 0x43a   : > { %v3277_v36 = vpop.f32.mrb[39].mxu1 }
 0x43b   : > { %v1398_v37 = vpack.c.bf16 %v3275_v33, %v3275_v33 }
 0x43d   : > { %3439 = vmatmul.mubr.msk.bf16.vlgmr.msra.gmra.mrb[40].mxu1 %vm934_vm0, %v1398_v37 }
 0x43e   : > { %3444 = vmatprep.mubr.msk.bf16.mxu1 %vm934_vm0, %v3739_v38 }
 0x503   : > { %v1911_v61 = vpop.f32.mrb[8].mxu0 }
 0x504   : > { %v1912_v62 = vadd.f32 %v3137_v60, %v1911_v61  ;;  %v3480_v63 = vpop.f32.mrb[9].mxu0 }
 0x505   : > { %v1914_v3 = vpop.f32.mrb[10].mxu0 }
 0x506   : > { %v1918_v4 = vmax.f32 %v1912_v62, 0.0  ;;  %v1915_v5 = vadd.f32 %v3137_v60, %v1914_v3  ;;  %v3481_v7 = vpop.f32.mrb[11].mxu0  ;;  %v3789_v3 = vld [vmem:[%s5298_s0 + $0x38] sm:$0xff]  }
 0x510   : > { %v1445_v44 = vpop.f32.mrb[40].mxu1 }
 0x511   : > { %v1446_v46 = vadd.f32 %v3101_v43, %v1445_v44  ;;  %v3440_v47 = vpop.f32.mrb[41].mxu1 }
 0x512   : > { %v1448_v48 = vpop.f32.mrb[42].mxu1 }
 0x513   : > { %v1451_v49 = vmax.f32 %v1446_v46, 0.0  ;;  %v3441_v50 = vpop.f32.mrb[43].mxu1 }
 0x515   : > { %v1452_v51 = vpack.c.bf16 %v1451_v49, %v1451_v49 }
 0x517   : > { %3568 = vmatprep.subr.msk.bf16.mxu1 %vm938_vm1, %v1452_v51  ;;  %v1582_v52 = vsel %vm938_vm1, %v1452_v51, 0 }
 0x518   : > { %3443 = vmatpush3.bf16.msra.mxu1 %v1582_v52 }
 0x519   : > { %3339 = vmatprep.subr.bf16.mxu1 %v4613_v0  ;;  %v3744_v0 = vld [vmem:[%s5248_s6 + $0x28] sm:$0xff]  }
 0x51b   : > { %3445 = vmatmul.mubr.msk.bf16.vlgmr.msra.gmra.mrb[44].mxu1 %vm934_vm0, %v3740_v53 }
 0x51c   : > { %3448 = vmatprep.mubr.msk.bf16.mxu1 %vm934_vm0, %v3741_v54  ;;  %3340 = vmatpush3.bf16.msra.mxu1 %v4616_v1  ;;  %v3745_v1 = vld [vmem:[%s5248_s6 + $0x30] sm:$0xff]  }
 0x51d   : > { %3341 = vmatprep.subr.bf16.mxu1 %v4619_v2  ;;  %v3746_v2 = vld [vmem:[%s5248_s6 + $0x38] sm:$0xff]  }
 0x520   : > { %3342 = vmatpush3.bf16.msra.mxu1 %v4624_v6  ;;  %v3747_v6 = vld [vmem:[%s5248_s6 + $0x40] sm:$0xff]  }
 0x521   : > { %3343 = vmatprep.subr.bf16.mxu1 %v4635_v10  ;;  %v3748_v10 = vld [vmem:[%s5248_s6 + $0x48] sm:$0xff]  }
 0x523   : > { %3449 = vmatmul.mubr.msk.bf16.gmra.mrb[48].mxu1 %vm934_vm0, %v3742_v55 }
 0x524   : > { %3452 = vmatprep.mubr.msk.bf16.mxu1 %vm934_vm0, %v3743_v56  ;;  %3344 = vmatpush3.bf16.msra.mxu1 %v4646_v14  ;;  %v3749_v14 = vld [vmem:[%s5248_s6 + $0x50] sm:$0xff]  }
 0x525   : > { %3345 = vmatprep.subr.bf16.mxu1 %v4658_v19  ;;  %v3750_v19 = vld [vmem:[%s5248_s6 + $0x58] sm:$0xff]  }
 0x528   : > { %3346 = vmatpush3.bf16.msra.mxu1 %v4661_v20  ;;  %v3751_v20 = vld [vmem:[%s5248_s6 + $0x60] sm:$0xff]  }
 0x529   : > { %3347 = vmatprep.subr.bf16.mxu1 %v4664_v21  ;;  %v3755_v21 = vld [vmem:[%s5248_s6 + $0x68] sm:$0xff]  }
 0x52b   : > { %3453 = vmatmul.mubr.msk.bf16.gmra.mrb[52].mxu1 %vm934_vm0, %v3744_v0 }
 0x52c   : > { %3456 = vmatprep.mubr.msk.bf16.mxu1 %vm934_vm0, %v3745_v1  ;;  %3348 = vmatpush3.bf16.msra.mxu1 %v4677_v26  ;;  %v3756_v26 = vld [vmem:[%s5248_s6 + $0x70] sm:$0xff]  }
 0x52d   : > { %3349 = vmatprep.subr.bf16.mxu1 %v4680_v27  ;;  %v3757_v27 = vld [vmem:[%s5248_s6 + $0x78] sm:$0xff]  }
 0x530   : > { %3350 = vmatpush3.bf16.msra.mxu1 %v4690_v31  ;;  %v3760_v31 = vld [vmem:[#allocation16 + $0x4] ss:$8 sps:$4 sm:$0xff]  }
 0x531   : > { %3351 = vmatprep.subr.bf16.mxu1 %v4701_v34  ;;  %v3758_v34 = vld [vmem:[#allocation16] ss:$8 sps:$4 sm:$0xff]  }
 0x533   : > { %3457 = vmatmul.mubr.msk.bf16.gmra.mrb[56].mxu1 %vm934_vm0, %v3746_v2 }
 0x534   : > { %3460 = vmatprep.mubr.msk.bf16.mxu1 %vm934_vm0, %v3747_v6  ;;  %3352 = vmatpush3.bf16.msra.mxu1 %v4714_v39  ;;  %v3761_v39 = vld [vmem:[#allocation16 + $0x14] ss:$8 sps:$4 sm:$0xff]  }
 0x535   : > { %3353 = vmatprep.subr.bf16.mxu1 %v4717_v40  ;;  %v2254_v40 = vld [vmem:[#allocation16 + $0x20] sm:$0x33] }
 0x536   : > { %v3176_v57 = vcombine.high %v2254_v40, %v2254_v40  ;;  %v3175_v58 = vcombine.low %v2254_v40, %v2254_v40 }
 0x538   : > { %3354 = vmatpush3.bf16.msra.mxu1 %v4728_v45  ;;  %v3763_v45 = vld [vmem:[#allocation16 + $0x10] ss:$8 sps:$4 sm:$0xff]  }
 0x539   : > { %3516 = vmatprep.subr.bf16.mxu1 %v4201_v59 }
 0x53b   : > { %3461 = vmatmul.mubr.msk.bf16.gmra.mrb[60].mxu1 %vm934_vm0, %v3748_v10 }
 0x53c   : > { %3464 = vmatprep.mubr.msk.bf16.mxu1 %vm934_vm0, %v3749_v14 }
 0x543   : > { %3465 = vmatmul.mubr.msk.bf16.gmra.mrb[64].mxu1 %vm934_vm0, %v3750_v19 }
 0x544   : > { %3468 = vmatprep.mubr.msk.bf16.mxu1 %vm934_vm0, %v3751_v20 }
 0x54b   : > { %3469 = vmatmul.mubr.msk.bf16.gmra.mrb[68].mxu1 %vm934_vm0, %v3755_v21 }
 0x54c   : > { %3472 = vmatprep.mubr.msk.bf16.mxu1 %vm934_vm0, %v3756_v26 }
 0x553   : > { %3473 = vmatmul.mubr.msk.bf16.gmra.mrb[72].mxu1 %vm934_vm0, %v3757_v27 }
 0x554   : > { %2348 = vmatprep.mubr.bf16.mxu1 %v3760_v31 }
 0x55b   : > { %2349 = vmatmul.mubr.bf16.vlgmr.msra.gmra.mrb[76].mxu1 %v3758_v34 }
 0x55c   : > { %2356 = vmatprep.mubr.bf16.mxu1 %v3761_v39  ;;  %3517 = vmatpush3.bf16.msra.mxu1 %v2391_v11  ;;  %v1919_v11 = vmax.f32 %v1915_v5, 0.0 }
 0x563   : > { %2357 = vmatmul.mubr.bf16.gmra.mrb[80].mxu1 %v3763_v45 }
 0x564   : > { %2364 = vmatprep.mubr.bf16.mxu1 %v3176_v57 }
 0x56b   : > { %2365 = vmatmul.mubr.bf16.gmra.mrb[84].mxu1 %v3175_v58 }
 0x56c   : > { %3518 = vmatprep.mubr.msk.bf16.mxu1 %vm4202_vm2, %v4201_v59 }
 0x5ee   : > { %v3446_v12 = vpop.f32.mrb[44].mxu1 }
 0x5ef   : > { %1747 = vst [vmem:[%s4629_s25 + $0x58] sm:$0xff] %v3446_v12  ;;  %v1618_v13 = vpop.f32.mrb[45].mxu1  ;;  %v1920_v12 = vpack.c.bf16 %v1919_v11, %v1918_v4  ;;  %v3790_v4 = vld [vmem:[%s5298_s0 + $0x40] sm:$0xff]   ;;  %v3791_v11 = vld [vmem:[%s5298_s0 + $0x48] sm:$0xff]  }
 0x5f0   : > { %1745 = vst [vmem:[%s4629_s25 + $0x8] sm:$0xff] %v1618_v13  ;;  %v3447_v15 = vpop.f32.mrb[46].mxu1 }
 0x5f1   : > { %1748 = vst [vmem:[%s4629_s25 + $0x80] sm:$0xff] %v3447_v15  ;;  %v1621_v16 = vpop.f32.mrb[47].mxu1  ;;  %v3766_v15 = vld [vmem:[%s5297_s10] sm:$0xff]  }
 0x5f2   : > { %1746 = vst [vmem:[%s4629_s25 + $0x30] sm:$0xff] %v1621_v16  ;;  %v3767_v16 = vld [vmem:[%s5297_s10 + $0x8] sm:$0xff]   ;;  %3484 = vmatprep.mubr.msk.bf16.mxu0 %vm2001_vm7, %v3766_v15 }
 0x5f6   : > { %v3450_v17 = vpop.f32.mrb[48].mxu1 }
 0x5f7   : > { %1751 = vst [vmem:[%s4629_s25 + $0xf8] sm:$0xff] %v3450_v17  ;;  %v1634_v18 = vpop.f32.mrb[49].mxu1  ;;  %v3768_v17 = vld [vmem:[%s5297_s10 + $0x10] sm:$0xff]  }
 0x5f8   : > { %1749 = vst [vmem:[%s4629_s25 + $0xa8] sm:$0xff] %v1634_v18  ;;  %v3451_v22 = vpop.f32.mrb[50].mxu1  ;;  %v3769_v18 = vld [vmem:[%s5297_s10 + $0x18] sm:$0xff]  }
 0x5f9   : > { %1752 = vst [vmem:[%s4629_s25 + $0x120] sm:$0xff] %v3451_v22  ;;  %v1637_v23 = vpop.f32.mrb[51].mxu1  ;;  %v3770_v22 = vld [vmem:[%s5297_s10 + $0x20] sm:$0xff]  }
 0x5fa   : > { %1750 = vst [vmem:[%s4629_s25 + $0xd0] sm:$0xff] %v1637_v23  ;;  %v3771_v23 = vld [vmem:[%s5297_s10 + $0x28] sm:$0xff]  }
 0x5fe   : > { %v3454_v24 = vpop.f32.mrb[52].mxu1 }
 0x5ff   : > { %1755 = vst [vmem:[%s4629_s25 + $0x198] sm:$0xff] %v3454_v24  ;;  %v1650_v25 = vpop.f32.mrb[53].mxu1  ;;  %v3772_v24 = vld [vmem:[%s5297_s10 + $0x30] sm:$0xff]  }
 0x600   : > { %1753 = vst [vmem:[%s4629_s25 + $0x148] sm:$0xff] %v1650_v25  ;;  %v3455_v28 = vpop.f32.mrb[54].mxu1  ;;  %v3773_v25 = vld [vmem:[%s5297_s10 + $0x38] sm:$0xff]  }
 0x601   : > { %1756 = vst [vmem:[%s4629_s25 + $0x1c0] sm:$0xff] %v3455_v28  ;;  %v1653_v29 = vpop.f32.mrb[55].mxu1  ;;  %v3774_v28 = vld [vmem:[%s5297_s10 + $0x40] sm:$0xff]  }
 0x602   : > { %1754 = vst [vmem:[%s4629_s25 + $0x170] sm:$0xff] %v1653_v29  ;;  %v3775_v29 = vld [vmem:[%s5297_s10 + $0x48] sm:$0xff]  }
 0x606   : > { %v3458_v30 = vpop.f32.mrb[56].mxu1 }
 0x607   : > { %1759 = vst [vmem:[%s4629_s25 + $0x238] sm:$0xff] %v3458_v30  ;;  %v1666_v32 = vpop.f32.mrb[57].mxu1  ;;  %v3776_v30 = vld [vmem:[%s5297_s10 + $0x50] sm:$0xff]  }
 0x608   : > { %1757 = vst [vmem:[%s4629_s25 + $0x1e8] sm:$0xff] %v1666_v32  ;;  %v3459_v33 = vpop.f32.mrb[58].mxu1  ;;  %v3777_v32 = vld [vmem:[%s5297_s10 + $0x58] sm:$0xff]  }
 0x609   : > { %1760 = vst [vmem:[%s4629_s25 + $0x260] sm:$0xff] %v3459_v33  ;;  %v1669_v35 = vpop.f32.mrb[59].mxu1  ;;  %v3778_v33 = vld [vmem:[%s5297_s10 + $0x60] sm:$0xff]  }
 0x60a   : > { %1758 = vst [vmem:[%s4629_s25 + $0x210] sm:$0xff] %v1669_v35  ;;  %v3779_v35 = vld [vmem:[%s5297_s10 + $0x68] sm:$0xff]  }
 0x60e   : > { %v3462_v36 = vpop.f32.mrb[60].mxu1 }
 0x60f   : > { %1763 = vst [vmem:[%s4629_s25 + $0x2d8] sm:$0xff] %v3462_v36  ;;  %v1682_v37 = vpop.f32.mrb[61].mxu1  ;;  %v3780_v36 = vld [vmem:[%s5297_s10 + $0x70] sm:$0xff]  }
 0x610   : > { %1761 = vst [vmem:[%s4629_s25 + $0x288] sm:$0xff] %v1682_v37  ;;  %v3463_v38 = vpop.f32.mrb[62].mxu1  ;;  %v3781_v37 = vld [vmem:[%s5297_s10 + $0x78] sm:$0xff]  }
 0x611   : > { %1764 = vst [vmem:[%s4629_s25 + $0x300] sm:$0xff] %v3463_v38  ;;  %v1685_v41 = vpop.f32.mrb[63].mxu1  ;;  %v3782_v38 = vld [vmem:[%s5298_s0] sm:$0xff]  }
 0x612   : > { %1762 = vst [vmem:[%s4629_s25 + $0x2b0] sm:$0xff] %v1685_v41  ;;  %v3177_v41 = vld [vmem:[#allocation19] ss:$0 sm:$0xff] }
 0x616   : > { %v3466_v42 = vpop.f32.mrb[64].mxu1 }
 0x617   : > { %1767 = vst [vmem:[%s4629_s25 + $0x378] sm:$0xff] %v3466_v42  ;;  %v1698_v43 = vpop.f32.mrb[65].mxu1 }
 0x618   : > { %1765 = vst [vmem:[%s4629_s25 + $0x328] sm:$0xff] %v1698_v43  ;;  %v3467_v44 = vpop.f32.mrb[66].mxu1 }
 0x619   : > { %1768 = vst [vmem:[%s4629_s25 + $0x3a0] sm:$0xff] %v3467_v44  ;;  %v1701_v46 = vpop.f32.mrb[67].mxu1 }
 0x61a   : > { %1766 = vst [vmem:[%s4629_s25 + $0x350] sm:$0xff] %v1701_v46 }
 0x61e   : > { %v3470_v47 = vpop.f32.mrb[68].mxu1 }
 0x61f   : > { %1771 = vst [vmem:[%s4629_s25 + $0x418] sm:$0xff] %v3470_v47  ;;  %v1714_v48 = vpop.f32.mrb[69].mxu1 }
 0x620   : > { %1769 = vst [vmem:[%s4629_s25 + $0x3c8] sm:$0xff] %v1714_v48  ;;  %v3471_v49 = vpop.f32.mrb[70].mxu1 }
 0x621   : > { %1772 = vst [vmem:[%s4629_s25 + $0x440] sm:$0xff] %v3471_v49  ;;  %v1717_v50 = vpop.f32.mrb[71].mxu1 }
 0x622   : > { %1770 = vst [vmem:[%s4629_s25 + $0x3f0] sm:$0xff] %v1717_v50 }
 0x626   : > { %v3474_v51 = vpop.f32.mrb[72].mxu1 }
 0x627   : > { %1775 = vst [vmem:[%s4629_s25 + $0x4b8] sm:$0xff] %v3474_v51  ;;  %v1730_v52 = vpop.f32.mrb[73].mxu1 }
 0x628   : > { %1773 = vst [vmem:[%s4629_s25 + $0x468] sm:$0xff] %v1730_v52  ;;  %v3475_v53 = vpop.f32.mrb[74].mxu1 }
 0x629   : > { %1776 = vst [vmem:[%s4629_s25 + $0x4e0] sm:$0xff] %v3475_v53  ;;  %v1733_v54 = vpop.f32.mrb[75].mxu1 }
 0x62a   : > { %1774 = vst [vmem:[%s4629_s25 + $0x490] sm:$0xff] %v1733_v54 }
 0x62e   : > { %v3355_v55 = vpop.f32.mrb[76].mxu1 }
 0x62f   : > { %v3356_v56 = vpop.f32.mrb[77].mxu1 }
 0x630   : > { %v3357_v0 = vadd.f32 %v3356_v56, %v3355_v55  ;;  %v3358_v1 = vpop.f32.mrb[78].mxu1 }
 0x631   : > { %v3359_v2 = vpop.f32.mrb[79].mxu1 }
 0x632   : > { %v3360_v6 = vadd.f32 %v3359_v2, %v3358_v1 }
 0x634   : > { %v2372_v10 = vpack.c.bf16 %v3360_v6, %v3357_v0 }
 0x636   : > { %3519 = vmatmul.mubr.msk.bf16.vlgmr.msra.gmra.mrb[88].mxu1 %vm934_vm0, %v2372_v10  ;;  %v3361_v14 = vpop.f32.mrb[80].mxu1 }
 0x637   : > { %v3362_v19 = vpop.f32.mrb[81].mxu1  ;;  %3522 = vmatprep.mubr.msk.bf16.mxu1 %vm4202_vm2, %v4201_v59 }
 0x638   : > { %v3363_v20 = vadd.f32 %v3362_v19, %v3361_v14  ;;  %v3364_v21 = vpop.f32.mrb[82].mxu1 }
 0x639   : > { %v3365_v26 = vpop.f32.mrb[83].mxu1 }
 0x63a   : > { %v3366_v27 = vadd.f32 %v3365_v26, %v3364_v21 }
 0x63c   : > { %v2373_v31 = vpack.c.bf16 %v3366_v27, %v3363_v20 }
 0x63e   : > { %3523 = vmatmul.mubr.msk.bf16.gmra.mrb[92].mxu1 %vm934_vm0, %v2373_v31  ;;  %v3367_v34 = vpop.f32.mrb[84].mxu1 }
 0x63f   : > { %v3368_v39 = vpop.f32.mrb[85].mxu1  ;;  %3526 = vmatprep.mubr.msk.bf16.mxu1 %vm4202_vm2, %v4201_v59  ;;  %v2053_v59 = vsel %vm2051_vm6, %v2052_v9, 0 }
 0x640   : > { %v3369_v40 = vadd.f32 %v3368_v39, %v3367_v34  ;;  %v3370_v45 = vpop.f32.mrb[86].mxu1  ;;  %v2055_v13 = vand.u32 %v2053_v59, %v1920_v12  ;;  %v3783_v34 = vld [vmem:[%s5298_s0 + $0x8] sm:$0xff]   ;;  %v3784_v39 = vld [vmem:[%s5298_s0 + $0x10] sm:$0xff]  }
 0x641   : > { %v3371_v57 = vpop.f32.mrb[87].mxu1  ;;  %v3786_v45 = vld [vmem:[%s5298_s0 + $0x20] sm:$0xff]   ;;  %v3792_v59 = vld [vmem:[%s5298_s0 + $0x50] sm:$0xff]  }
 0x642   : > { %v2374_v58 = vpack.c.bf16 %v3369_v40, %v3369_v40  ;;  %3482 = vmatprep.subr.bf16.mxu0 %v2055_v13  ;;  %v3785_v40 = vld [vmem:[%s5298_s0 + $0x18] sm:$0xff]   ;;  %v3787_v57 = vld [vmem:[%s5298_s0 + $0x28] sm:$0xff]  }
 0x643   : > { %3483 = vmatpush3.bf16.msra.mxu0 %v2055_v13 }
 0x646   : > { %3527 = vmatmul.mubr.msk.bf16.gmra.mrb[96].mxu1 %vm934_vm0, %v2374_v58  ;;  %3485 = vmatmul.mubr.msk.bf16.vlgmr.msra.gmra.mrb[12].mxu0 %vm2001_vm7, %v3767_v16  ;;  %v3788_v58 = vld [vmem:[%s5298_s0 + $0x30] sm:$0xff]  }
 0x647   : > { %3488 = vmatprep.mubr.msk.bf16.mxu0 %vm2001_vm7, %v3768_v17  ;;  %v3793_v17 = vld [vmem:[%s5298_s0 + $0x58] sm:$0xff]  }
 0x64e   : > { %3489 = vmatmul.mubr.msk.bf16.gmra.mrb[16].mxu0 %vm2001_vm7, %v3769_v18  ;;  %v3794_v18 = vld [vmem:[%s5298_s0 + $0x60] sm:$0xff]  }
 0x64f   : > { %3492 = vmatprep.mubr.msk.bf16.mxu0 %vm2001_vm7, %v3770_v22 }
 0x656   : > { %3493 = vmatmul.mubr.msk.bf16.gmra.mrb[20].mxu0 %vm2001_vm7, %v3771_v23 }
 0x657   : > { %3496 = vmatprep.mubr.msk.bf16.mxu0 %vm2001_vm7, %v3772_v24 }
 0x65e   : > { %3497 = vmatmul.mubr.msk.bf16.gmra.mrb[24].mxu0 %vm2001_vm7, %v3773_v25 }
 0x65f   : > { %3500 = vmatprep.mubr.msk.bf16.mxu0 %vm2001_vm7, %v3774_v28  ;;  %v3795_v28 = vld [vmem:[%s5298_s0 + $0x68] sm:$0xff]  }
 0x666   : > { %3501 = vmatmul.mubr.msk.bf16.gmra.mrb[28].mxu0 %vm2001_vm7, %v3775_v29  ;;  %v3796_v29 = vld [vmem:[%s5298_s0 + $0x70] sm:$0xff]  }
 0x667   : > { %3504 = vmatprep.mubr.msk.bf16.mxu0 %vm2001_vm7, %v3776_v30 }
 0x66e   : > { %3505 = vmatmul.mubr.msk.bf16.gmra.mrb[32].mxu0 %vm2001_vm7, %v3777_v32 }
 0x66f   : > { %3508 = vmatprep.mubr.msk.bf16.mxu0 %vm2001_vm7, %v3778_v33 }
 0x676   : > { %3509 = vmatmul.mubr.msk.bf16.gmra.mrb[36].mxu0 %vm2001_vm7, %v3779_v35 }
 0x677   : > { %3512 = vmatprep.mubr.msk.bf16.mxu0 %vm2001_vm7, %v3780_v36  ;;  %v3797_v36 = vld [vmem:[%s5298_s0 + $0x78] sm:$0xff]  }
 0x67e   : > { %3513 = vmatmul.mubr.msk.bf16.gmra.mrb[40].mxu0 %vm2001_vm7, %v3781_v37 }
 0x67f   : > { %3536 = vmatprep.mubr.msk.bf16.mxu0 %vm2537_vm8, %v3782_v38 }
 0x709   : > { %v2427_v42 = vpop.f32.mrb[88].mxu1 }
 0x70a   : > { %v2428_v43 = vadd.f32 %v3177_v41, %v2427_v42  ;;  %v3520_v44 = vpop.f32.mrb[89].mxu1 }
 0x70b   : > { %v2430_v46 = vpop.f32.mrb[90].mxu1 }
 0x70c   : > { %v2431_v47 = vadd.f32 %v3177_v41, %v2430_v46  ;;  %v3521_v48 = vpop.f32.mrb[91].mxu1  ;;  %v2449_v49 = vmax.f32 %v2428_v43, 0.0 }
 0x70e   : > { %v2450_v50 = vmax.f32 %v2431_v47, 0.0 }
 0x710   : > { %v2454_v51 = vpack.c.bf16 %v2450_v50, %v2449_v49 }
 0x711   : > { %v2435_v52 = vpop.f32.mrb[92].mxu1 }
 0x712   : > { %3530 = vmatprep.subr.bf16.mxu0 %v2454_v51  ;;  %v2436_v53 = vadd.f32 %v3177_v41, %v2435_v52  ;;  %v3524_v54 = vpop.f32.mrb[93].mxu1 }
 0x713   : > { %3531 = vmatpush3.bf16.msra.mxu0 %v2454_v51  ;;  %v2438_v55 = vpop.f32.mrb[94].mxu1 }
 0x714   : > { %v2439_v56 = vadd.f32 %v3177_v41, %v2438_v55  ;;  %v3525_v0 = vpop.f32.mrb[95].mxu1  ;;  %v2451_v1 = vmax.f32 %v2436_v53, 0.0 }
 0x716   : > { %v2452_v2 = vmax.f32 %v2439_v56, 0.0 }
 0x718   : > { %v2455_v6 = vpack.c.bf16 %v2452_v2, %v2451_v1 }
 0x719   : > { %v2443_v10 = vpop.f32.mrb[96].mxu1  ;;  %v3486_v60 = vpop.f32.mrb[12].mxu0 }
 0x71a   : > { %3532 = vmatprep.subr.bf16.mxu0 %v2455_v6  ;;  %v2444_v14 = vadd.f32 %v3177_v41, %v2443_v10  ;;  %v3528_v19 = vpop.f32.mrb[97].mxu1  ;;  %2220 = vst [vmem:[%s4629_s25 + $0x60] sm:$0xff] %v3486_v60  ;;  %v2091_v61 = vpop.f32.mrb[13].mxu0 }
 0x71b   : > { %3533 = vmatpush3.bf16.msra.mxu0 %v2455_v6  ;;  %v2446_v20 = vpop.f32.mrb[98].mxu1  ;;  %2218 = vst [vmem:[%s4629_s25 + $0x10] sm:$0xff] %v2091_v61  ;;  %v3487_v62 = vpop.f32.mrb[14].mxu0 }
 0x71c   : > { %v2453_v21 = vmax.f32 %v2444_v14, 0.0  ;;  %v3529_v26 = vpop.f32.mrb[99].mxu1  ;;  %2221 = vst [vmem:[%s4629_s25 + $0x88] sm:$0xff] %v3487_v62  ;;  %v2094_v63 = vpop.f32.mrb[15].mxu0 }
 0x71d   : > { %2219 = vst [vmem:[%s4629_s25 + $0x38] sm:$0xff] %v2094_v63 }
 0x71e   : > { %v2456_v27 = vpack.c.bf16 %v2453_v21, %v2453_v21 }
 0x720   : > { %3569 = vmatprep.subr.msk.bf16.mxu0 %vm938_vm1, %v2456_v27  ;;  %v2587_v31 = vsel %vm938_vm1, %v2456_v27, 0 }
 0x721   : > { %3535 = vmatpush3.bf16.msra.mxu0 %v2587_v31  ;;  %v3490_v5 = vpop.f32.mrb[16].mxu0 }
 0x722   : > { %2224 = vst [vmem:[%s4629_s25 + $0x100] sm:$0xff] %v3490_v5  ;;  %v2107_v7 = vpop.f32.mrb[17].mxu0 }
 0x723   : > { %2222 = vst [vmem:[%s4629_s25 + $0xb0] sm:$0xff] %v2107_v7  ;;  %v3491_v8 = vpop.f32.mrb[18].mxu0 }
 0x724   : > { %3537 = vmatmul.mubr.msk.bf16.vlgmr.msra.gmra.mrb[44].mxu0 %vm2537_vm8, %v3783_v34  ;;  %2225 = vst [vmem:[%s4629_s25 + $0x128] sm:$0xff] %v3491_v8  ;;  %v2110_v9 = vpop.f32.mrb[19].mxu0 }
 0x725   : > { %3540 = vmatprep.mubr.msk.bf16.mxu0 %vm2537_vm8, %v3784_v39  ;;  %2223 = vst [vmem:[%s4629_s25 + $0xd8] sm:$0xff] %v2110_v9 }
 0x729   : > { %v3494_v12 = vpop.f32.mrb[20].mxu0 }
 0x72a   : > { %2228 = vst [vmem:[%s4629_s25 + $0x1a0] sm:$0xff] %v3494_v12  ;;  %v2123_v13 = vpop.f32.mrb[21].mxu0 }
 0x72b   : > { %2226 = vst [vmem:[%s4629_s25 + $0x150] sm:$0xff] %v2123_v13  ;;  %v3495_v15 = vpop.f32.mrb[22].mxu0 }
 0x72c   : > { %3541 = vmatmul.mubr.msk.bf16.gmra.mrb[48].mxu0 %vm2537_vm8, %v3785_v40  ;;  %2229 = vst [vmem:[%s4629_s25 + $0x1c8] sm:$0xff] %v3495_v15  ;;  %v2126_v16 = vpop.f32.mrb[23].mxu0 }
 0x72d   : > { %3544 = vmatprep.mubr.msk.bf16.mxu0 %vm2537_vm8, %v3786_v45  ;;  %2227 = vst [vmem:[%s4629_s25 + $0x178] sm:$0xff] %v2126_v16 }
 0x731   : > { %v3498_v22 = vpop.f32.mrb[24].mxu0 }
 0x732   : > { %2232 = vst [vmem:[%s4629_s25 + $0x240] sm:$0xff] %v3498_v22  ;;  %v2139_v23 = vpop.f32.mrb[25].mxu0 }
 0x733   : > { %2230 = vst [vmem:[%s4629_s25 + $0x1f0] sm:$0xff] %v2139_v23  ;;  %v3499_v24 = vpop.f32.mrb[26].mxu0 }
 0x734   : > { %3545 = vmatmul.mubr.msk.bf16.gmra.mrb[52].mxu0 %vm2537_vm8, %v3787_v57  ;;  %2233 = vst [vmem:[%s4629_s25 + $0x268] sm:$0xff] %v3499_v24  ;;  %v2142_v25 = vpop.f32.mrb[27].mxu0 }
 0x735   : > { %3548 = vmatprep.mubr.msk.bf16.mxu0 %vm2537_vm8, %v3788_v58  ;;  %2231 = vst [vmem:[%s4629_s25 + $0x218] sm:$0xff] %v2142_v25 }
 0x739   : > { %v3502_v30 = vpop.f32.mrb[28].mxu0 }
 0x73a   : > { %2236 = vst [vmem:[%s4629_s25 + $0x2e0] sm:$0xff] %v3502_v30  ;;  %v2155_v32 = vpop.f32.mrb[29].mxu0 }
 0x73b   : > { %2234 = vst [vmem:[%s4629_s25 + $0x290] sm:$0xff] %v2155_v32  ;;  %v3503_v33 = vpop.f32.mrb[30].mxu0 }
 0x73c   : > { %3549 = vmatmul.mubr.msk.bf16.gmra.mrb[56].mxu0 %vm2537_vm8, %v3789_v3  ;;  %2237 = vst [vmem:[%s4629_s25 + $0x308] sm:$0xff] %v3503_v33  ;;  %v2158_v35 = vpop.f32.mrb[31].mxu0 }
 0x73d   : > { %3552 = vmatprep.mubr.msk.bf16.mxu0 %vm2537_vm8, %v3790_v4  ;;  %2235 = vst [vmem:[%s4629_s25 + $0x2b8] sm:$0xff] %v2158_v35 }
 0x741   : > { %v3506_v37 = vpop.f32.mrb[32].mxu0 }
 0x742   : > { %2240 = vst [vmem:[%s4629_s25 + $0x380] sm:$0xff] %v3506_v37  ;;  %v2171_v38 = vpop.f32.mrb[33].mxu0 }
 0x743   : > { %2238 = vst [vmem:[%s4629_s25 + $0x330] sm:$0xff] %v2171_v38  ;;  %v3507_v41 = vpop.f32.mrb[34].mxu0 }
 0x744   : > { %3553 = vmatmul.mubr.msk.bf16.gmra.mrb[60].mxu0 %vm2537_vm8, %v3791_v11  ;;  %2241 = vst [vmem:[%s4629_s25 + $0x3a8] sm:$0xff] %v3507_v41  ;;  %v2174_v42 = vpop.f32.mrb[35].mxu0 }
 0x745   : > { %3556 = vmatprep.mubr.msk.bf16.mxu0 %vm2537_vm8, %v3792_v59  ;;  %2239 = vst [vmem:[%s4629_s25 + $0x358] sm:$0xff] %v2174_v42 }
 0x749   : > { %v3510_v43 = vpop.f32.mrb[36].mxu0 }
 0x74a   : > { %2244 = vst [vmem:[%s4629_s25 + $0x420] sm:$0xff] %v3510_v43  ;;  %v2187_v44 = vpop.f32.mrb[37].mxu0 }
 0x74b   : > { %2242 = vst [vmem:[%s4629_s25 + $0x3d0] sm:$0xff] %v2187_v44  ;;  %v3511_v46 = vpop.f32.mrb[38].mxu0 }
 0x74c   : > { %3557 = vmatmul.mubr.msk.bf16.gmra.mrb[64].mxu0 %vm2537_vm8, %v3793_v17  ;;  %2245 = vst [vmem:[%s4629_s25 + $0x448] sm:$0xff] %v3511_v46  ;;  %v2190_v47 = vpop.f32.mrb[39].mxu0 }
 0x74d   : > { %3560 = vmatprep.mubr.msk.bf16.mxu0 %vm2537_vm8, %v3794_v18  ;;  %2243 = vst [vmem:[%s4629_s25 + $0x3f8] sm:$0xff] %v2190_v47 }
 0x751   : > { %v3514_v48 = vpop.f32.mrb[40].mxu0 }
 0x752   : > { %2248 = vst [vmem:[%s4629_s25 + $0x4c0] sm:$0xff] %v3514_v48  ;;  %v2203_v49 = vpop.f32.mrb[41].mxu0 }
 0x753   : > { %2246 = vst [vmem:[%s4629_s25 + $0x470] sm:$0xff] %v2203_v49  ;;  %v3515_v50 = vpop.f32.mrb[42].mxu0 }
 0x754   : > { %3561 = vmatmul.mubr.msk.bf16.gmra.mrb[68].mxu0 %vm2537_vm8, %v3795_v28  ;;  %2249 = vst [vmem:[%s4629_s25 + $0x4e8] sm:$0xff] %v3515_v50  ;;  %v2206_v51 = vpop.f32.mrb[43].mxu0 }
 0x755   : > { %3564 = vmatprep.mubr.msk.bf16.mxu0 %vm2537_vm8, %v3796_v29  ;;  %2247 = vst [vmem:[%s4629_s25 + $0x498] sm:$0xff] %v2206_v51 }
 0x75c   : > { %3565 = vmatmul.mubr.msk.bf16.gmra.mrb[72].mxu0 %vm2537_vm8, %v3797_v36 }
 0x7f7   : > { %v3538_v52 = vpop.f32.mrb[44].mxu0 }
 0x7f8   : > { %2752 = vst [vmem:[%s4629_s25 + $0x68] sm:$0xff] %v3538_v52  ;;  %v2623_v53 = vpop.f32.mrb[45].mxu0 }
 0x7f9   : > { %2750 = vst [vmem:[%s4629_s25 + $0x18] sm:$0xff] %v2623_v53  ;;  %v3539_v54 = vpop.f32.mrb[46].mxu0 }
 0x7fa   : > { %2753 = vst [vmem:[%s4629_s25 + $0x90] sm:$0xff] %v3539_v54  ;;  %v2626_v55 = vpop.f32.mrb[47].mxu0 }
 0x7fb   : > { %2751 = vst [vmem:[%s4629_s25 + $0x40] sm:$0xff] %v2626_v55 }
 0x7ff   : > { %v3542_v56 = vpop.f32.mrb[48].mxu0 }
 0x800   : > { %2756 = vst [vmem:[%s4629_s25 + $0x108] sm:$0xff] %v3542_v56  ;;  %v2639_v0 = vpop.f32.mrb[49].mxu0 }
 0x801   : > { %2754 = vst [vmem:[%s4629_s25 + $0xb8] sm:$0xff] %v2639_v0  ;;  %v3543_v1 = vpop.f32.mrb[50].mxu0 }
 0x802   : > { %2757 = vst [vmem:[%s4629_s25 + $0x130] sm:$0xff] %v3543_v1  ;;  %v2642_v2 = vpop.f32.mrb[51].mxu0 }
 0x803   : > { %2755 = vst [vmem:[%s4629_s25 + $0xe0] sm:$0xff] %v2642_v2 }
 0x807   : > { %v3546_v6 = vpop.f32.mrb[52].mxu0 }
 0x808   : > { %2760 = vst [vmem:[%s4629_s25 + $0x1a8] sm:$0xff] %v3546_v6  ;;  %v2655_v10 = vpop.f32.mrb[53].mxu0 }
 0x809   : > { %2758 = vst [vmem:[%s4629_s25 + $0x158] sm:$0xff] %v2655_v10  ;;  %v3547_v14 = vpop.f32.mrb[54].mxu0 }
 0x80a   : > { %2761 = vst [vmem:[%s4629_s25 + $0x1d0] sm:$0xff] %v3547_v14  ;;  %v2658_v19 = vpop.f32.mrb[55].mxu0 }
 0x80b   : > { %2759 = vst [vmem:[%s4629_s25 + $0x180] sm:$0xff] %v2658_v19 }
 0x80f   : > { %v3550_v20 = vpop.f32.mrb[56].mxu0 }
 0x810   : > { %2764 = vst [vmem:[%s4629_s25 + $0x248] sm:$0xff] %v3550_v20  ;;  %v2671_v21 = vpop.f32.mrb[57].mxu0 }
 0x811   : > { %2762 = vst [vmem:[%s4629_s25 + $0x1f8] sm:$0xff] %v2671_v21  ;;  %v3551_v26 = vpop.f32.mrb[58].mxu0 }
 0x812   : > { %2765 = vst [vmem:[%s4629_s25 + $0x270] sm:$0xff] %v3551_v26  ;;  %v2674_v27 = vpop.f32.mrb[59].mxu0 }
 0x813   : > { %2763 = vst [vmem:[%s4629_s25 + $0x220] sm:$0xff] %v2674_v27 }
 0x817   : > { %v3554_v31 = vpop.f32.mrb[60].mxu0 }
 0x818   : > { %2768 = vst [vmem:[%s4629_s25 + $0x2e8] sm:$0xff] %v3554_v31  ;;  %v2687_v34 = vpop.f32.mrb[61].mxu0 }
 0x819   : > { %2766 = vst [vmem:[%s4629_s25 + $0x298] sm:$0xff] %v2687_v34  ;;  %v3555_v39 = vpop.f32.mrb[62].mxu0 }
 0x81a   : > { %2769 = vst [vmem:[%s4629_s25 + $0x310] sm:$0xff] %v3555_v39  ;;  %v2690_v40 = vpop.f32.mrb[63].mxu0 }
 0x81b   : > { %2767 = vst [vmem:[%s4629_s25 + $0x2c0] sm:$0xff] %v2690_v40 }
 0x81f   : > { %v3558_v45 = vpop.f32.mrb[64].mxu0 }
 0x820   : > { %2772 = vst [vmem:[%s4629_s25 + $0x388] sm:$0xff] %v3558_v45  ;;  %v2703_v57 = vpop.f32.mrb[65].mxu0 }
 0x821   : > { %2770 = vst [vmem:[%s4629_s25 + $0x338] sm:$0xff] %v2703_v57  ;;  %v3559_v58 = vpop.f32.mrb[66].mxu0 }
 0x822   : > { %2773 = vst [vmem:[%s4629_s25 + $0x3b0] sm:$0xff] %v3559_v58  ;;  %v2706_v60 = vpop.f32.mrb[67].mxu0 }
 0x823   : > { %2771 = vst [vmem:[%s4629_s25 + $0x360] sm:$0xff] %v2706_v60 }
 0x827   : > { %v3562_v61 = vpop.f32.mrb[68].mxu0 }
 0x828   : > { %2776 = vst [vmem:[%s4629_s25 + $0x428] sm:$0xff] %v3562_v61  ;;  %v2719_v62 = vpop.f32.mrb[69].mxu0 }
 0x829   : > { %2774 = vst [vmem:[%s4629_s25 + $0x3d8] sm:$0xff] %v2719_v62  ;;  %v3563_v63 = vpop.f32.mrb[70].mxu0 }
 0x82a   : > { %2777 = vst [vmem:[%s4629_s25 + $0x450] sm:$0xff] %v3563_v63  ;;  %v2722_v3 = vpop.f32.mrb[71].mxu0 }
 0x82b   : > { %2775 = vst [vmem:[%s4629_s25 + $0x400] sm:$0xff] %v2722_v3 }
 0x82f   : > { %v3566_v4 = vpop.f32.mrb[72].mxu0 }
 0x830   : > { %2780 = vst [vmem:[%s4629_s25 + $0x4c8] sm:$0xff] %v3566_v4  ;;  %v2735_v5 = vpop.f32.mrb[73].mxu0 }
 0x831   : > { %2778 = vst [vmem:[%s4629_s25 + $0x478] sm:$0xff] %v2735_v5  ;;  %v3567_v7 = vpop.f32.mrb[74].mxu0 }
 0x832   : > { %2781 = vst [vmem:[%s4629_s25 + $0x4f0] sm:$0xff] %v3567_v7  ;;  %v2738_v8 = vpop.f32.mrb[75].mxu0 }
 0x833   : > { %2779 = vst [vmem:[%s4629_s25 + $0x4a0] sm:$0xff] %v2738_v8 }
 0x834 PF: > { %s5299_s28 = sld [smem:[#allocation28_spill]] }
 0x83a   : > { %s34_s24 = sadd.s32 1, %s5299_s28  }
 0x83b   : > { %p31_p7 = scmp.ge.s32.totalorder %s34_s24, 4  }
 0x83d   :  { %33 = sbr.rel (!%p31_p7) target bundleno = 13 (0xd), region = 167 }
 0x844   :  { %2867 = vsyncpa [#allocation3], 1 }
 0x845   :  { %2869 = vsyncpa [#allocation3 + $0x1], 1 }
 0x846   :  { %2870 = vsyncpa [#allocation5], 1 }
 0x847   :  { %2871 = vsyncpa [#allocation8], 1 }
 0x848   :  { %2872 = vsyncpa [#allocation11], 1 }
 0x849   :  { %2873 = vsyncpa [#allocation14], 1 }
 0x84a   :  { %2874 = vsyncpa [#allocation17], 1 }
 0x84b   :  { %2875 = vsyncpa [#allocation20], 1 }

</bundles_post_ra>
